<compile_context>
chip_gen: v7x
topology: tpu7x:2x2x1
jax: 0.10.0
libtpu: 0.0.40
codegen_flags: <defaults>
</compile_context>

<pallas_src>
import functools

import jax
import jax.numpy as jnp
from jax import lax
from jax.experimental import pallas as pl
from jax.experimental.pallas import tpu as pltpu


def _sigmoid(x):
    # exact sigmoid (the gates are tiny: (1, HW) and (C, 1)); exp -> EUP.
    return 1.0 / (1.0 + jnp.exp(-x))


def dual_att_kernel(H, W, CH, base,
                    x_ref, wconv_ref, ws1_ref, pack_c_ref, pack_s_ref, misc_ref,
                    out_ref, line_ref, patch_ref):
    """One batch element; channel-major (channels, H*W) layout throughout."""
    HW = H * W
    Cin = x_ref.shape[1]

    # ---- unpack the packed per-channel operands (static lane slices) ----
    conv_scale = pack_c_ref[:, 0:1]                    # (C, 1)  folded BN scale
    conv_shift = pack_c_ref[:, 1:2]                    # (C, 1)  folded BN shift (+conv bias)
    bc2        = pack_c_ref[:, 2:3]                    # (C, 1)  channel-attn conv2 bias
    wc1_t      = pack_c_ref[:, 3:3 + CH]               # (C, CH) channel-attn conv1 weight^T
    wc2        = pack_c_ref[:, 3 + CH:3 + 2 * CH]      # (C, CH) channel-attn conv2 weight
    s1_scale   = pack_s_ref[:, 0:1]                    # (C4, 1) spatial BN scale
    s1_shift   = pack_s_ref[:, 1:2]                    # (C4, 1) spatial BN shift
    ws2        = pack_s_ref[:, 2:3]                    # (C4, 1) spatial conv2 weight
    bs2        = misc_ref[:, 0:1]                      # (1, 1)  spatial conv2 bias
    bc1        = misc_ref[:, 1:1 + CH]                 # (1, CH) channel-attn conv1 bias

    # ---- c3x3rb: zero-framed flat line buffer -> im2col -> one fused-K dot ----
    # line_ref = [zeros(base) | x (bf16, flat HW) | zeros]; a tap shift of
    # s = dh*W + dw is then the static lane slice [base+s : base+s+HW].
    line_ref[...] = jnp.zeros_like(line_ref)
    line_ref[:, base:base + HW] = x_ref[0].astype(jnp.bfloat16)   # aligned store

    wcol = lax.broadcasted_iota(jnp.int32, (1, HW), 1) % W        # in-row column idx
    k = 0
    for dh in (-1, 0, 1):
        for dw in (-1, 0, 1):
            off = base + dh * W + dw
            win = line_ref[:, off:off + HW]                       # (Cin, HW) bf16
            if dw != 0:
                # horizontal "SAME" padding: kill taps that crossed a row edge
                # (vertical padding is handled by the zero frame already).
                valid = (wcol + dw >= 0) & (wcol + dw < W)
                win = jnp.where(valid, win, 0.0)
            patch_ref[k * Cin:(k + 1) * Cin, :] = win
            k += 1

    acc = jnp.dot(wconv_ref[...], patch_ref[...],
                  preferred_element_type=jnp.float32)             # (C, HW) f32

    # folded BN (conv bias folded in) + ReLU — f32 epilogue
    fused = jnp.maximum(acc * conv_scale + conv_shift, 0.0)       # (C, HW)
    fused_bf = fused.astype(jnp.bfloat16)

    # ---- spatial attention: 1x1 conv + BN + ReLU + 1x1 conv(->1) + sigmoid ----
    s1 = jnp.dot(ws1_ref[...], fused_bf,
                 preferred_element_type=jnp.float32)              # (C4, HW)
    s1 = jnp.maximum(s1 * s1_scale + s1_shift, 0.0)
    s2 = jnp.sum(s1 * ws2, axis=0, keepdims=True) + bs2           # (1, HW)
    spatial = _sigmoid(s2)

    # ---- channel attention: GAP + 1x1 + ReLU + 1x1 + sigmoid (VPU/XLU only) ----
    avg = jnp.mean(fused, axis=1, keepdims=True)                  # (C, 1)
    c1 = jnp.maximum(jnp.sum(wc1_t * avg, axis=0, keepdims=True) + bc1, 0.0)  # (1, CH)
    c2 = jnp.sum(wc2 * c1, axis=1, keepdims=True) + bc2           # (C, 1)
    channel = _sigmoid(c2)

    # ---- fea = (spatial + 1) * (fused * channel) ----
    out_ref[0] = ((spatial + 1.0) * (fused * channel)).astype(out_ref.dtype)


def init_params(key, cin=32, cout=32):
    ks = jax.random.split(key, 17)
    nrm = lambda k, shape, s=0.1: (jax.random.normal(k, shape) * s).astype(jnp.float32)
    c4, ch = cout // 4, cout // 16
    p = {}
    # c3x3rb: Conv2d(cin, cout, 3, padding=1, bias=True) + BN(cout)
    p['conv_w'] = nrm(ks[0], (cout, cin, 3, 3))
    p['conv_b'] = nrm(ks[1], (cout,))
    p['bn1_gamma'] = 1.0 + nrm(ks[2], (cout,))
    p['bn1_beta'] = nrm(ks[3], (cout,))
    p['bn1_mean'] = nrm(ks[4], (cout,))
    p['bn1_var'] = jnp.abs(nrm(ks[5], (cout,))) + 1.0
    # spatialAttn: Conv2d(cout, c4, 1, bias=False) + BN(c4) + ReLU + Conv2d(c4, 1, 1) + Sigmoid
    p['s_w1'] = nrm(ks[6], (c4, cout, 1, 1))
    p['bn2_gamma'] = 1.0 + nrm(ks[7], (c4,))
    p['bn2_beta'] = nrm(ks[8], (c4,))
    p['bn2_mean'] = nrm(ks[9], (c4,))
    p['bn2_var'] = jnp.abs(nrm(ks[10], (c4,))) + 1.0
    p['s_w2'] = nrm(ks[11], (1, c4, 1, 1))
    p['s_b2'] = nrm(ks[12], (1,))
    # channelAttn: AvgPool(1) + Conv2d(cout, ch, 1) + ReLU + Conv2d(ch, cout, 1) + Sigmoid
    p['c_w1'] = nrm(ks[13], (ch, cout, 1, 1))
    p['c_b1'] = nrm(ks[14], (ch,))
    p['c_w2'] = nrm(ks[15], (cout, ch, 1, 1))
    p['c_b2'] = nrm(ks[16], (cout,))
    return p


def prepare_kernel_params(p, eps=1e-5):
    cout, cin = p['conv_w'].shape[0], p['conv_w'].shape[1]
    ch = p['c_w1'].shape[0]

    # 3x3 conv weight, channel-major fused-K operand: (Cout, 9*Cin), tap-major
    # over Cin so it matches the im2col row order built in the kernel.
    wconv = jnp.transpose(p['conv_w'], (0, 2, 3, 1)).reshape(cout, 9 * cin)
    wconv = wconv.astype(jnp.bfloat16)

    scale1 = p['bn1_gamma'] / jnp.sqrt(p['bn1_var'] + eps)
    shift1 = p['bn1_beta'] + scale1 * (p['conv_b'] - p['bn1_mean'])   # fold conv bias

    ws1 = p['s_w1'][:, :, 0, 0].astype(jnp.bfloat16)                  # (C4, C)
    scale2 = p['bn2_gamma'] / jnp.sqrt(p['bn2_var'] + eps)
    shift2 = p['bn2_beta'] - scale2 * p['bn2_mean']
    ws2 = p['s_w2'][0, :, 0, 0]                                       # (C4,)
    bs2 = p['s_b2']                                                   # (1,)

    wc1_t = p['c_w1'][:, :, 0, 0].T                                   # (C, CH)
    bc1 = p['c_b1']                                                   # (CH,)
    wc2 = p['c_w2'][:, :, 0, 0]                                       # (C, CH)
    bc2 = p['c_b2']                                                   # (C,)

    col = lambda v: v.reshape(-1, 1).astype(jnp.float32)
    pack_c = jnp.concatenate([col(scale1), col(shift1), col(bc2), wc1_t, wc2],
                             axis=1).astype(jnp.float32)              # (C, 3+2*CH)
    pack_s = jnp.concatenate([col(scale2), col(shift2), col(ws2)],
                             axis=1).astype(jnp.float32)              # (C4, 3)
    misc = jnp.concatenate([bs2, bc1]).reshape(1, -1).astype(jnp.float32)  # (1, 1+CH)

    return dict(wconv=wconv, ws1=ws1, pack_c=pack_c, pack_s=pack_s, misc=misc)


def dual_att_conblock_pallas(x_nchw, kp):
    B, Cin, H, W = x_nchw.shape
    HW = H * W
    C = kp['wconv'].shape[0]
    C4 = kp['ws1'].shape[0]
    CH = (kp['pack_c'].shape[1] - 3) // 2

    # lane-aligned left frame for the flat line buffer (>= W+1, multiple of 128
    # so the single activation store into it is a fully aligned store)
    base = ((W + 1 + 127) // 128) * 128
    line_w = base + HW + W + 2

    # contiguous merge of the minor dims: free, stays NCHW / f32 — no transpose,
    # no pad, no cast pass over the activation in the wrapper.
    x_flat = x_nchw.reshape(B, Cin, HW)

    kernel = functools.partial(dual_att_kernel, H, W, CH, base)

    grid_spec = pltpu.PrefetchScalarGridSpec(
        num_scalar_prefetch=0,
        grid=(B,),
        in_specs=[
            pl.BlockSpec((1, Cin, HW), lambda b: (b, 0, 0)),     # x  (f32, flat NCHW)
            pl.BlockSpec((C, 9 * Cin), lambda b: (0, 0)),        # conv weight (bf16)
            pl.BlockSpec((C4, C), lambda b: (0, 0)),             # spatial 1x1 weight (bf16)
            pl.BlockSpec((C, 3 + 2 * CH), lambda b: (0, 0)),     # packed per-C operands
            pl.BlockSpec((C4, 3), lambda b: (0, 0)),             # packed per-C4 operands
            pl.BlockSpec((1, 1 + CH), lambda b: (0, 0)),         # bs2 | bc1
        ],
        out_specs=pl.BlockSpec((1, C, HW), lambda b: (b, 0, 0)),
        scratch_shapes=[
            pltpu.VMEM((Cin, line_w), jnp.bfloat16),             # zero-framed line buffer
            pltpu.VMEM((9 * Cin, HW), jnp.bfloat16),             # im2col patches
        ],
    )

    out = pl.pallas_call(
        kernel,
        out_shape=jax.ShapeDtypeStruct((B, C, HW), jnp.float32),
        grid_spec=grid_spec,
        compiler_params=pltpu.CompilerParams(
            dimension_semantics=("parallel",)),
    )(x_flat, kp['wconv'], kp['ws1'], kp['pack_c'], kp['pack_s'], kp['misc'])

    # (B, C, HW) is already NCHW — final reshape is a free metadata op.
    return out.reshape(B, C, H, W)


def reference(x, p, eps=1e-5):
    """Pure-JAX mirror of the PyTorch forward (eval-mode BN), NCHW, f32."""
    def conv(x, w, b=None):
        y = lax.conv_general_dilated(x, w, (1, 1), 'SAME',
                                     dimension_numbers=('NCHW', 'OIHW', 'NCHW'))
        return y if b is None else y + b.reshape(1, -1, 1, 1)

    def bn(x, g, be, m, v):
        sh = lambda a: a.reshape(1, -1, 1, 1)
        return (x - sh(m)) / jnp.sqrt(sh(v) + eps) * sh(g) + sh(be)

    fused = jax.nn.relu(bn(conv(x, p['conv_w'], p['conv_b']),
                           p['bn1_gamma'], p['bn1_beta'], p['bn1_mean'], p['bn1_var']))
    s = jax.nn.relu(bn(conv(fused, p['s_w1']),
                       p['bn2_gamma'], p['bn2_beta'], p['bn2_mean'], p['bn2_var']))
    spatial = jax.nn.sigmoid(conv(s, p['s_w2'], p['s_b2']))
    avg = jnp.mean(fused, axis=(2, 3), keepdims=True)
    c = jax.nn.relu(conv(avg, p['c_w1'], p['c_b1']))
    channel = jax.nn.sigmoid(conv(c, p['c_w2'], p['c_b2']))
    channel = fused * channel
    return (spatial + 1.0) * channel


if __name__ == "__main__":
    key = jax.random.PRNGKey(0)
    kx, kparam = jax.random.split(key)
    B, Cin, Cout, H, W = 2, 32, 32, 16, 16

    x = jax.random.normal(kx, (B, Cin, H, W), dtype=jnp.float32)
    params = init_params(kparam, Cin, Cout)
    kparams = prepare_kernel_params(params)

    out = dual_att_conblock_pallas(x, kparams)
    out = jax.block_until_ready(out)
    assert out.shape == (B, Cout, H, W)

    ref = reference(x, params)
    err = float(jnp.max(jnp.abs(out - ref)))
    # bf16 MXU operands (f32 accumulation); expected max-abs error vs the f32
    # reference is ~1e-2 at these scales.
    if not err < 5e-2:
        raise AssertionError(f"kernel/reference mismatch, max abs err = {err}")

    print("KERNEL_OK")
</pallas_src>

<mosaic_0001>
module attributes {stable_mosaic.version = 11 : i64} {
  func.func @dual_att_kernel(%arg0: i32, %arg1: memref<1x32x256xf32, #tpu.memory_space<vmem>>, %arg2: memref<32x288xbf16, #tpu.memory_space<vmem>>, %arg3: memref<8x32xbf16, #tpu.memory_space<vmem>>, %arg4: memref<32x7xf32, #tpu.memory_space<vmem>>, %arg5: memref<8x3xf32, #tpu.memory_space<vmem>>, %arg6: memref<1x3xf32, #tpu.memory_space<vmem>>, %arg7: memref<1x32x256xf32, #tpu.memory_space<vmem>>, %arg8: memref<32x402xbf16, #tpu.memory_space<vmem>>, %arg9: memref<288x256xbf16, #tpu.memory_space<vmem>>) attributes {dimension_semantics = [#tpu.dimension_semantics<parallel>], iteration_bounds = array<i64: 2>, scalar_prefetch = 0 : i64, scratch_operands = 2 : i64, tpu.core_type = #tpu.core_type<tc>, window_params = [{transform_indices = @transform_0, window_bounds = array<i64: 1, 32, 256>}, {pipeline_mode = #tpu.pipeline_mode<synchronous>, transform_indices = @transform_1, window_bounds = array<i64: 32, 288>}, {pipeline_mode = #tpu.pipeline_mode<synchronous>, transform_indices = @transform_2, window_bounds = array<i64: 8, 32>}, {pipeline_mode = #tpu.pipeline_mode<synchronous>, transform_indices = @transform_3, window_bounds = array<i64: 32, 7>}, {pipeline_mode = #tpu.pipeline_mode<synchronous>, transform_indices = @transform_4, window_bounds = array<i64: 8, 3>}, {pipeline_mode = #tpu.pipeline_mode<synchronous>, transform_indices = @transform_5, window_bounds = array<i64: 1, 3>}, {transform_indices = @transform_6, window_bounds = array<i64: 1, 32, 256>}]} {
    %c0 = arith.constant 0 : index
    %c0_0 = arith.constant 0 : index
    %0 = vector.load %arg4[%c0, %c0_0] : memref<32x7xf32, #tpu.memory_space<vmem>>, vector<32x1xf32>
    %c0_1 = arith.constant 0 : index
    %c1 = arith.constant 1 : index
    %1 = vector.load %arg4[%c0_1, %c1] : memref<32x7xf32, #tpu.memory_space<vmem>>, vector<32x1xf32>
    %c0_2 = arith.constant 0 : index
    %c2 = arith.constant 2 : index
    %2 = vector.load %arg4[%c0_2, %c2] : memref<32x7xf32, #tpu.memory_space<vmem>>, vector<32x1xf32>
    %c0_3 = arith.constant 0 : index
    %c3 = arith.constant 3 : index
    %3 = vector.load %arg4[%c0_3, %c3] : memref<32x7xf32, #tpu.memory_space<vmem>>, vector<32x2xf32>
    %c0_4 = arith.constant 0 : index
    %c5 = arith.constant 5 : index
    %4 = vector.load %arg4[%c0_4, %c5] : memref<32x7xf32, #tpu.memory_space<vmem>>, vector<32x2xf32>
    %c0_5 = arith.constant 0 : index
    %c0_6 = arith.constant 0 : index
    %5 = vector.load %arg5[%c0_5, %c0_6] : memref<8x3xf32, #tpu.memory_space<vmem>>, vector<8x1xf32>
    %c0_7 = arith.constant 0 : index
    %c1_8 = arith.constant 1 : index
    %6 = vector.load %arg5[%c0_7, %c1_8] : memref<8x3xf32, #tpu.memory_space<vmem>>, vector<8x1xf32>
    %c0_9 = arith.constant 0 : index
    %c2_10 = arith.constant 2 : index
    %7 = vector.load %arg5[%c0_9, %c2_10] : memref<8x3xf32, #tpu.memory_space<vmem>>, vector<8x1xf32>
    %c0_11 = arith.constant 0 : index
    %c0_12 = arith.constant 0 : index
    %8 = vector.load %arg6[%c0_11, %c0_12] : memref<1x3xf32, #tpu.memory_space<vmem>>, vector<1x1xf32>
    %c0_13 = arith.constant 0 : index
    %c1_14 = arith.constant 1 : index
    %9 = vector.load %arg6[%c0_13, %c1_14] : memref<1x3xf32, #tpu.memory_space<vmem>>, vector<1x2xf32>
    %cst = arith.constant 0.000000e+00 : bf16
    %10 = vector.broadcast %cst : bf16 to vector<32x402xbf16>
    %c0_15 = arith.constant 0 : index
    %c0_16 = arith.constant 0 : index
    %11 = vector.load %arg8[%c0_15, %c0_16] : memref<32x402xbf16, #tpu.memory_space<vmem>>, vector<32x402xbf16>
    tpu.vector_store %arg8[%c0_15, %c0_16], %10 {strides = array<i32>} : memref<32x402xbf16, #tpu.memory_space<vmem>>, vector<32x402xbf16>,
    %c0_17 = arith.constant 0 : index
    %c0_18 = arith.constant 0 : index
    %c0_19 = arith.constant 0 : index
    %12 = vector.load %arg1[%c0_17, %c0_18, %c0_19] : memref<1x32x256xf32, #tpu.memory_space<vmem>>, vector<1x32x256xf32>
    %13 = vector.shape_cast %12 : vector<1x32x256xf32> to vector<32x256xf32>
    %14 = arith.truncf %13 : vector<32x256xf32> to vector<32x256xbf16>
    %c0_20 = arith.constant 0 : index
    %c128 = arith.constant 128 : index
    %15 = vector.load %arg8[%c0_20, %c128] : memref<32x402xbf16, #tpu.memory_space<vmem>>, vector<32x256xbf16>
    tpu.vector_store %arg8[%c0_20, %c128], %14 {strides = array<i32>} : memref<32x402xbf16, #tpu.memory_space<vmem>>, vector<32x256xbf16>,
    %16 = tpu.iota {dimensions = array<i32: 1>} : vector<1x256xi32>
    %c16_i32 = arith.constant 16 : i32
    %c0_i32 = arith.constant 0 : i32
    %17 = arith.cmpi eq, %c16_i32, %c0_i32 : i32
    %c1_i32 = arith.constant 1 : i32
    %18 = arith.select %17, %c1_i32, %c16_i32 : i32
    %19 = vector.broadcast %18 : i32 to vector<1x256xi32>
    %20 = arith.remsi %16, %19 : vector<1x256xi32>
    %c0_i32_21 = arith.constant 0 : i32
    %21 = vector.broadcast %c0_i32_21 : i32 to vector<1x256xi32>
    %22 = arith.cmpi ne, %20, %21 : vector<1x256xi32>
    %c0_i32_22 = arith.constant 0 : i32
    %23 = vector.broadcast %c0_i32_22 : i32 to vector<1x256xi32>
    %24 = arith.cmpi slt, %20, %23 : vector<1x256xi32>
    %c0_i32_23 = arith.constant 0 : i32
    %25 = arith.cmpi slt, %18, %c0_i32_23 : i32
    %26 = vector.broadcast %25 : i1 to vector<1x256xi1>
    %27 = vector.broadcast %26 : vector<1x256xi1> to vector<1x256xi1>
    %28 = arith.xori %24, %27 : vector<1x256xi1>
    %29 = arith.andi %28, %22 : vector<1x256xi1>
    %30 = vector.broadcast %18 : i32 to vector<1x256xi32>
    %31 = arith.addi %20, %30 : vector<1x256xi32>
    %32 = arith.select %29, %31, %20 : vector<1x256xi1>, vector<1x256xi32>
    %c0_24 = arith.constant 0 : index
    %c111 = arith.constant 111 : index
    %33 = vector.load %arg8[%c0_24, %c111] : memref<32x402xbf16, #tpu.memory_space<vmem>>, vector<32x256xbf16>
    %c-1_i32 = arith.constant -1 : i32
    %34 = vector.broadcast %c-1_i32 : i32 to vector<1x256xi32>
    %35 = arith.addi %32, %34 : vector<1x256xi32>
    %c0_i32_25 = arith.constant 0 : i32
    %36 = vector.broadcast %c0_i32_25 : i32 to vector<1x256xi32>
    %37 = arith.cmpi sge, %35, %36 : vector<1x256xi32>
    %c-1_i32_26 = arith.constant -1 : i32
    %38 = vector.broadcast %c-1_i32_26 : i32 to vector<1x256xi32>
    %39 = arith.addi %32, %38 : vector<1x256xi32>
    %c16_i32_27 = arith.constant 16 : i32
    %40 = vector.broadcast %c16_i32_27 : i32 to vector<1x256xi32>
    %41 = arith.cmpi slt, %39, %40 : vector<1x256xi32>
    %42 = arith.andi %37, %41 : vector<1x256xi1>
    %cst_28 = arith.constant 0.000000e+00 : f32
    %43 = arith.truncf %cst_28 : f32 to bf16
    %44 = vector.shape_cast %42 : vector<1x256xi1> to vector<1x256xi1>
    %45 = vector.broadcast %44 : vector<1x256xi1> to vector<32x256xi1>
    %46 = vector.broadcast %43 : bf16 to vector<32x256xbf16>
    %47 = arith.select %45, %33, %46 : vector<32x256xi1>, vector<32x256xbf16>
    %c0_29 = arith.constant 0 : index
    %c0_30 = arith.constant 0 : index
    %48 = vector.load %arg9[%c0_29, %c0_30] : memref<288x256xbf16, #tpu.memory_space<vmem>>, vector<32x256xbf16>
    tpu.vector_store %arg9[%c0_29, %c0_30], %47 {strides = array<i32>} : memref<288x256xbf16, #tpu.memory_space<vmem>>, vector<32x256xbf16>,
    %c0_31 = arith.constant 0 : index
    %c112 = arith.constant 112 : index
    %49 = vector.load %arg8[%c0_31, %c112] : memref<32x402xbf16, #tpu.memory_space<vmem>>, vector<32x256xbf16>
    %c32 = arith.constant 32 : index
    %c0_32 = arith.constant 0 : index
    %50 = vector.load %arg9[%c32, %c0_32] : memref<288x256xbf16, #tpu.memory_space<vmem>>, vector<32x256xbf16>
    tpu.vector_store %arg9[%c32, %c0_32], %49 {strides = array<i32>} : memref<288x256xbf16, #tpu.memory_space<vmem>>, vector<32x256xbf16>,
    %c0_33 = arith.constant 0 : index
    %c113 = arith.constant 113 : index
    %51 = vector.load %arg8[%c0_33, %c113] : memref<32x402xbf16, #tpu.memory_space<vmem>>, vector<32x256xbf16>
    %c1_i32_34 = arith.constant 1 : i32
    %52 = vector.broadcast %c1_i32_34 : i32 to vector<1x256xi32>
    %53 = arith.addi %32, %52 : vector<1x256xi32>
    %c0_i32_35 = arith.constant 0 : i32
    %54 = vector.broadcast %c0_i32_35 : i32 to vector<1x256xi32>
    %55 = arith.cmpi sge, %53, %54 : vector<1x256xi32>
    %c1_i32_36 = arith.constant 1 : i32
    %56 = vector.broadcast %c1_i32_36 : i32 to vector<1x256xi32>
    %57 = arith.addi %32, %56 : vector<1x256xi32>
    %c16_i32_37 = arith.constant 16 : i32
    %58 = vector.broadcast %c16_i32_37 : i32 to vector<1x256xi32>
    %59 = arith.cmpi slt, %57, %58 : vector<1x256xi32>
    %60 = arith.andi %55, %59 : vector<1x256xi1>
    %cst_38 = arith.constant 0.000000e+00 : f32
    %61 = arith.truncf %cst_38 : f32 to bf16
    %62 = vector.shape_cast %60 : vector<1x256xi1> to vector<1x256xi1>
    %63 = vector.broadcast %62 : vector<1x256xi1> to vector<32x256xi1>
    %64 = vector.broadcast %61 : bf16 to vector<32x256xbf16>
    %65 = arith.select %63, %51, %64 : vector<32x256xi1>, vector<32x256xbf16>
    %c64 = arith.constant 64 : index
    %c0_39 = arith.constant 0 : index
    %66 = vector.load %arg9[%c64, %c0_39] : memref<288x256xbf16, #tpu.memory_space<vmem>>, vector<32x256xbf16>
    tpu.vector_store %arg9[%c64, %c0_39], %65 {strides = array<i32>} : memref<288x256xbf16, #tpu.memory_space<vmem>>, vector<32x256xbf16>,
    %c0_40 = arith.constant 0 : index
    %c127 = arith.constant 127 : index
    %67 = vector.load %arg8[%c0_40, %c127] : memref<32x402xbf16, #tpu.memory_space<vmem>>, vector<32x256xbf16>
    %c-1_i32_41 = arith.constant -1 : i32
    %68 = vector.broadcast %c-1_i32_41 : i32 to vector<1x256xi32>
    %69 = arith.addi %32, %68 : vector<1x256xi32>
    %c0_i32_42 = arith.constant 0 : i32
    %70 = vector.broadcast %c0_i32_42 : i32 to vector<1x256xi32>
    %71 = arith.cmpi sge, %69, %70 : vector<1x256xi32>
    %c-1_i32_43 = arith.constant -1 : i32
    %72 = vector.broadcast %c-1_i32_43 : i32 to vector<1x256xi32>
    %73 = arith.addi %32, %72 : vector<1x256xi32>
    %c16_i32_44 = arith.constant 16 : i32
    %74 = vector.broadcast %c16_i32_44 : i32 to vector<1x256xi32>
    %75 = arith.cmpi slt, %73, %74 : vector<1x256xi32>
    %76 = arith.andi %71, %75 : vector<1x256xi1>
    %cst_45 = arith.constant 0.000000e+00 : f32
    %77 = arith.truncf %cst_45 : f32 to bf16
    %78 = vector.shape_cast %76 : vector<1x256xi1> to vector<1x256xi1>
    %79 = vector.broadcast %78 : vector<1x256xi1> to vector<32x256xi1>
    %80 = vector.broadcast %77 : bf16 to vector<32x256xbf16>
    %81 = arith.select %79, %67, %80 : vector<32x256xi1>, vector<32x256xbf16>
    %c96 = arith.constant 96 : index
    %c0_46 = arith.constant 0 : index
    %82 = vector.load %arg9[%c96, %c0_46] : memref<288x256xbf16, #tpu.memory_space<vmem>>, vector<32x256xbf16>
    tpu.vector_store %arg9[%c96, %c0_46], %81 {strides = array<i32>} : memref<288x256xbf16, #tpu.memory_space<vmem>>, vector<32x256xbf16>,
    %c0_47 = arith.constant 0 : index
    %c128_48 = arith.constant 128 : index
    %83 = vector.load %arg8[%c0_47, %c128_48] : memref<32x402xbf16, #tpu.memory_space<vmem>>, vector<32x256xbf16>
    %c128_49 = arith.constant 128 : index
    %c0_50 = arith.constant 0 : index
    %84 = vector.load %arg9[%c128_49, %c0_50] : memref<288x256xbf16, #tpu.memory_space<vmem>>, vector<32x256xbf16>
    tpu.vector_store %arg9[%c128_49, %c0_50], %83 {strides = array<i32>} : memref<288x256xbf16, #tpu.memory_space<vmem>>, vector<32x256xbf16>,
    %c0_51 = arith.constant 0 : index
    %c129 = arith.constant 129 : index
    %85 = vector.load %arg8[%c0_51, %c129] : memref<32x402xbf16, #tpu.memory_space<vmem>>, vector<32x256xbf16>
    %c1_i32_52 = arith.constant 1 : i32
    %86 = vector.broadcast %c1_i32_52 : i32 to vector<1x256xi32>
    %87 = arith.addi %32, %86 : vector<1x256xi32>
    %c0_i32_53 = arith.constant 0 : i32
    %88 = vector.broadcast %c0_i32_53 : i32 to vector<1x256xi32>
    %89 = arith.cmpi sge, %87, %88 : vector<1x256xi32>
    %c1_i32_54 = arith.constant 1 : i32
    %90 = vector.broadcast %c1_i32_54 : i32 to vector<1x256xi32>
    %91 = arith.addi %32, %90 : vector<1x256xi32>
    %c16_i32_55 = arith.constant 16 : i32
    %92 = vector.broadcast %c16_i32_55 : i32 to vector<1x256xi32>
    %93 = arith.cmpi slt, %91, %92 : vector<1x256xi32>
    %94 = arith.andi %89, %93 : vector<1x256xi1>
    %cst_56 = arith.constant 0.000000e+00 : f32
    %95 = arith.truncf %cst_56 : f32 to bf16
    %96 = vector.shape_cast %94 : vector<1x256xi1> to vector<1x256xi1>
    %97 = vector.broadcast %96 : vector<1x256xi1> to vector<32x256xi1>
    %98 = vector.broadcast %95 : bf16 to vector<32x256xbf16>
    %99 = arith.select %97, %85, %98 : vector<32x256xi1>, vector<32x256xbf16>
    %c160 = arith.constant 160 : index
    %c0_57 = arith.constant 0 : index
    %100 = vector.load %arg9[%c160, %c0_57] : memref<288x256xbf16, #tpu.memory_space<vmem>>, vector<32x256xbf16>
    tpu.vector_store %arg9[%c160, %c0_57], %99 {strides = array<i32>} : memref<288x256xbf16, #tpu.memory_space<vmem>>, vector<32x256xbf16>,
    %c0_58 = arith.constant 0 : index
    %c143 = arith.constant 143 : index
    %101 = vector.load %arg8[%c0_58, %c143] : memref<32x402xbf16, #tpu.memory_space<vmem>>, vector<32x256xbf16>
    %c-1_i32_59 = arith.constant -1 : i32
    %102 = vector.broadcast %c-1_i32_59 : i32 to vector<1x256xi32>
    %103 = arith.addi %32, %102 : vector<1x256xi32>
    %c0_i32_60 = arith.constant 0 : i32
    %104 = vector.broadcast %c0_i32_60 : i32 to vector<1x256xi32>
    %105 = arith.cmpi sge, %103, %104 : vector<1x256xi32>
    %c-1_i32_61 = arith.constant -1 : i32
    %106 = vector.broadcast %c-1_i32_61 : i32 to vector<1x256xi32>
    %107 = arith.addi %32, %106 : vector<1x256xi32>
    %c16_i32_62 = arith.constant 16 : i32
    %108 = vector.broadcast %c16_i32_62 : i32 to vector<1x256xi32>
    %109 = arith.cmpi slt, %107, %108 : vector<1x256xi32>
    %110 = arith.andi %105, %109 : vector<1x256xi1>
    %cst_63 = arith.constant 0.000000e+00 : f32
    %111 = arith.truncf %cst_63 : f32 to bf16
    %112 = vector.shape_cast %110 : vector<1x256xi1> to vector<1x256xi1>
    %113 = vector.broadcast %112 : vector<1x256xi1> to vector<32x256xi1>
    %114 = vector.broadcast %111 : bf16 to vector<32x256xbf16>
    %115 = arith.select %113, %101, %114 : vector<32x256xi1>, vector<32x256xbf16>
    %c192 = arith.constant 192 : index
    %c0_64 = arith.constant 0 : index
    %116 = vector.load %arg9[%c192, %c0_64] : memref<288x256xbf16, #tpu.memory_space<vmem>>, vector<32x256xbf16>
    tpu.vector_store %arg9[%c192, %c0_64], %115 {strides = array<i32>} : memref<288x256xbf16, #tpu.memory_space<vmem>>, vector<32x256xbf16>,
    %c0_65 = arith.constant 0 : index
    %c144 = arith.constant 144 : index
    %117 = vector.load %arg8[%c0_65, %c144] : memref<32x402xbf16, #tpu.memory_space<vmem>>, vector<32x256xbf16>
    %c224 = arith.constant 224 : index
    %c0_66 = arith.constant 0 : index
    %118 = vector.load %arg9[%c224, %c0_66] : memref<288x256xbf16, #tpu.memory_space<vmem>>, vector<32x256xbf16>
    tpu.vector_store %arg9[%c224, %c0_66], %117 {strides = array<i32>} : memref<288x256xbf16, #tpu.memory_space<vmem>>, vector<32x256xbf16>,
    %c0_67 = arith.constant 0 : index
    %c145 = arith.constant 145 : index
    %119 = vector.load %arg8[%c0_67, %c145] : memref<32x402xbf16, #tpu.memory_space<vmem>>, vector<32x256xbf16>
    %c1_i32_68 = arith.constant 1 : i32
    %120 = vector.broadcast %c1_i32_68 : i32 to vector<1x256xi32>
    %121 = arith.addi %32, %120 : vector<1x256xi32>
    %c0_i32_69 = arith.constant 0 : i32
    %122 = vector.broadcast %c0_i32_69 : i32 to vector<1x256xi32>
    %123 = arith.cmpi sge, %121, %122 : vector<1x256xi32>
    %c1_i32_70 = arith.constant 1 : i32
    %124 = vector.broadcast %c1_i32_70 : i32 to vector<1x256xi32>
    %125 = arith.addi %32, %124 : vector<1x256xi32>
    %c16_i32_71 = arith.constant 16 : i32
    %126 = vector.broadcast %c16_i32_71 : i32 to vector<1x256xi32>
    %127 = arith.cmpi slt, %125, %126 : vector<1x256xi32>
    %128 = arith.andi %123, %127 : vector<1x256xi1>
    %cst_72 = arith.constant 0.000000e+00 : f32
    %129 = arith.truncf %cst_72 : f32 to bf16
    %130 = vector.shape_cast %128 : vector<1x256xi1> to vector<1x256xi1>
    %131 = vector.broadcast %130 : vector<1x256xi1> to vector<32x256xi1>
    %132 = vector.broadcast %129 : bf16 to vector<32x256xbf16>
    %133 = arith.select %131, %119, %132 : vector<32x256xi1>, vector<32x256xbf16>
    %c256 = arith.constant 256 : index
    %c0_73 = arith.constant 0 : index
    %134 = vector.load %arg9[%c256, %c0_73] : memref<288x256xbf16, #tpu.memory_space<vmem>>, vector<32x256xbf16>
    tpu.vector_store %arg9[%c256, %c0_73], %133 {strides = array<i32>} : memref<288x256xbf16, #tpu.memory_space<vmem>>, vector<32x256xbf16>,
    %c0_74 = arith.constant 0 : index
    %c0_75 = arith.constant 0 : index
    %135 = vector.load %arg2[%c0_74, %c0_75] : memref<32x288xbf16, #tpu.memory_space<vmem>>, vector<32x288xbf16>
    %c0_76 = arith.constant 0 : index
    %c0_77 = arith.constant 0 : index
    %136 = vector.load %arg9[%c0_76, %c0_77] : memref<288x256xbf16, #tpu.memory_space<vmem>>, vector<288x256xbf16>
    %cst_78 = arith.constant dense<0.000000e+00> : vector<32x256xf32>
    %137 = tpu.matmul %135, %136, %cst_78 {dimension_numbers = #tpu.dot_dimension_numbers<[1], [0], [0], [1], [0, 0, 1, 1], [], []>} : vector<32x288xbf16>, vector<288x256xbf16>, vector<32x256xf32> -> vector<32x256xf32>
    %138 = vector.broadcast %0 : vector<32x1xf32> to vector<32x256xf32>
    %139 = arith.mulf %137, %138 : vector<32x256xf32>
    %140 = vector.broadcast %1 : vector<32x1xf32> to vector<32x256xf32>
    %141 = arith.addf %139, %140 : vector<32x256xf32>
    %cst_79 = arith.constant 0.000000e+00 : f32
    %142 = vector.broadcast %cst_79 : f32 to vector<32x256xf32>
    %143 = arith.maximumf %141, %142 : vector<32x256xf32>
    %144 = arith.truncf %143 : vector<32x256xf32> to vector<32x256xbf16>
    %c0_80 = arith.constant 0 : index
    %c0_81 = arith.constant 0 : index
    %145 = vector.load %arg3[%c0_80, %c0_81] : memref<8x32xbf16, #tpu.memory_space<vmem>>, vector<8x32xbf16>
    %cst_82 = arith.constant dense<0.000000e+00> : vector<8x256xf32>
    %146 = tpu.matmul %145, %144, %cst_82 {dimension_numbers = #tpu.dot_dimension_numbers<[1], [0], [0], [1], [0, 0, 1, 1], [], []>} : vector<8x32xbf16>, vector<32x256xbf16>, vector<8x256xf32> -> vector<8x256xf32>
    %147 = vector.broadcast %5 : vector<8x1xf32> to vector<8x256xf32>
    %148 = arith.mulf %146, %147 : vector<8x256xf32>
    %149 = vector.broadcast %6 : vector<8x1xf32> to vector<8x256xf32>
    %150 = arith.addf %148, %149 : vector<8x256xf32>
    %cst_83 = arith.constant 0.000000e+00 : f32
    %151 = vector.broadcast %cst_83 : f32 to vector<8x256xf32>
    %152 = arith.maximumf %150, %151 : vector<8x256xf32>
    %153 = vector.broadcast %7 : vector<8x1xf32> to vector<8x256xf32>
    %154 = arith.mulf %152, %153 : vector<8x256xf32>
    %cst_84 = arith.constant dense<0.000000e+00> : vector<256xf32>
    %155 = vector.multi_reduction <add>, %154, %cst_84 [0] : vector<8x256xf32> to vector<256xf32>
    %156 = vector.shape_cast %155 : vector<256xf32> to vector<1x256xf32>
    %157 = vector.broadcast %8 : vector<1x1xf32> to vector<1x256xf32>
    %158 = arith.addf %156, %157 : vector<1x256xf32>
    %cst_85 = arith.constant 0.000000e+00 : f32
    %159 = vector.broadcast %cst_85 : f32 to vector<1x256xf32>
    %160 = arith.subf %159, %158 : vector<1x256xf32>
    %161 = math.exp %160 : vector<1x256xf32>
    %cst_86 = arith.constant 1.000000e+00 : f32
    %162 = vector.broadcast %cst_86 : f32 to vector<1x256xf32>
    %163 = arith.addf %162, %161 : vector<1x256xf32>
    %cst_87 = arith.constant 1.000000e+00 : f32
    %164 = vector.broadcast %cst_87 : f32 to vector<1x256xf32>
    %165 = arith.divf %164, %163 : vector<1x256xf32>
    %cst_88 = arith.constant dense<0.000000e+00> : vector<32xf32>
    %166 = vector.multi_reduction <add>, %143, %cst_88 [1] : vector<32x256xf32> to vector<32xf32>
    %167 = vector.shape_cast %166 : vector<32xf32> to vector<32x1xf32>
    %cst_89 = arith.constant 2.560000e+02 : f32
    %168 = vector.broadcast %cst_89 : f32 to vector<32x1xf32>
    %169 = arith.divf %167, %168 : vector<32x1xf32>
    %170 = vector.broadcast %169 : vector<32x1xf32> to vector<32x2xf32>
    %171 = arith.mulf %3, %170 : vector<32x2xf32>
    %cst_90 = arith.constant dense<0.000000e+00> : vector<2xf32>
    %172 = vector.multi_reduction <add>, %171, %cst_90 [0] : vector<32x2xf32> to vector<2xf32>
    %173 = vector.shape_cast %172 : vector<2xf32> to vector<1x2xf32>
    %174 = arith.addf %173, %9 : vector<1x2xf32>
    %cst_91 = arith.constant 0.000000e+00 : f32
    %175 = vector.broadcast %cst_91 : f32 to vector<1x2xf32>
    %176 = arith.maximumf %174, %175 : vector<1x2xf32>
    %177 = vector.broadcast %176 : vector<1x2xf32> to vector<32x2xf32>
    %178 = arith.mulf %4, %177 : vector<32x2xf32>
    %cst_92 = arith.constant dense<0.000000e+00> : vector<32xf32>
    %179 = vector.multi_reduction <add>, %178, %cst_92 [1] : vector<32x2xf32> to vector<32xf32>
    %180 = vector.shape_cast %179 : vector<32xf32> to vector<32x1xf32>
    %181 = arith.addf %180, %2 : vector<32x1xf32>
    %cst_93 = arith.constant 0.000000e+00 : f32
    %182 = vector.broadcast %cst_93 : f32 to vector<32x1xf32>
    %183 = arith.subf %182, %181 : vector<32x1xf32>
    %184 = math.exp %183 : vector<32x1xf32>
    %cst_94 = arith.constant 1.000000e+00 : f32
    %185 = vector.broadcast %cst_94 : f32 to vector<32x1xf32>
    %186 = arith.addf %185, %184 : vector<32x1xf32>
    %cst_95 = arith.constant 1.000000e+00 : f32
    %187 = vector.broadcast %cst_95 : f32 to vector<32x1xf32>
    %188 = arith.divf %187, %186 : vector<32x1xf32>
    %cst_96 = arith.constant 1.000000e+00 : f32
    %189 = vector.broadcast %cst_96 : f32 to vector<1x256xf32>
    %190 = arith.addf %165, %189 : vector<1x256xf32>
    %191 = vector.broadcast %188 : vector<32x1xf32> to vector<32x256xf32>
    %192 = arith.mulf %143, %191 : vector<32x256xf32>
    %193 = vector.broadcast %190 : vector<1x256xf32> to vector<32x256xf32>
    %194 = arith.mulf %193, %192 : vector<32x256xf32>
    %c0_97 = arith.constant 0 : index
    %c0_98 = arith.constant 0 : index
    %c0_99 = arith.constant 0 : index
    %195 = vector.load %arg7[%c0_97, %c0_98, %c0_99] : memref<1x32x256xf32, #tpu.memory_space<vmem>>, vector<1x32x256xf32>
    %196 = vector.shape_cast %195 : vector<1x32x256xf32> to vector<32x256xf32>
    %197 = vector.shape_cast %194 : vector<32x256xf32> to vector<1x32x256xf32>
    tpu.vector_store %arg7[%c0_97, %c0_98, %c0_99], %197 {strides = array<i32>} : memref<1x32x256xf32, #tpu.memory_space<vmem>>, vector<1x32x256xf32>,
    return
  }
  func.func @transform_0(%arg0: i32) -> (i32, i32, i32) {
    %c0_i32 = arith.constant 0 : i32
    %c0_i32_0 = arith.constant 0 : i32
    %c0_i32_1 = arith.constant 0 : i32
    return %arg0, %c0_i32, %c0_i32_0 : i32, i32, i32
  }
  func.func @transform_1(%arg0: i32) -> (i32, i32) {
    %c0_i32 = arith.constant 0 : i32
    %c0_i32_0 = arith.constant 0 : i32
    %c0_i32_1 = arith.constant 0 : i32
    return %c0_i32, %c0_i32_0 : i32, i32
  }
  func.func @transform_2(%arg0: i32) -> (i32, i32) {
    %c0_i32 = arith.constant 0 : i32
    %c0_i32_0 = arith.constant 0 : i32
    %c0_i32_1 = arith.constant 0 : i32
    return %c0_i32, %c0_i32_0 : i32, i32
  }
  func.func @transform_3(%arg0: i32) -> (i32, i32) {
    %c0_i32 = arith.constant 0 : i32
    %c0_i32_0 = arith.constant 0 : i32
    %c0_i32_1 = arith.constant 0 : i32
    return %c0_i32, %c0_i32_0 : i32, i32
  }
  func.func @transform_4(%arg0: i32) -> (i32, i32) {
    %c0_i32 = arith.constant 0 : i32
    %c0_i32_0 = arith.constant 0 : i32
    %c0_i32_1 = arith.constant 0 : i32
    return %c0_i32, %c0_i32_0 : i32, i32
  }
  func.func @transform_5(%arg0: i32) -> (i32, i32) {
    %c0_i32 = arith.constant 0 : i32
    %c0_i32_0 = arith.constant 0 : i32
    %c0_i32_1 = arith.constant 0 : i32
    return %c0_i32, %c0_i32_0 : i32, i32
  }
  func.func @transform_6(%arg0: i32) -> (i32, i32, i32) {
    %c0_i32 = arith.constant 0 : i32
    %c0_i32_0 = arith.constant 0 : i32
    %c0_i32_1 = arith.constant 0 : i32
    return %arg0, %c0_i32, %c0_i32_0 : i32, i32, i32
  }
}

</mosaic_0001>

<bundles_post_ra>
// kernel: tpu_custom_call.1
= control target key start
LH: loop header
LB: loop body
LE: loop exit
PB: predicated region body
PF: predicated region fallthrough
CT: control target
= control target key end

     0   :  { %11 = vsyncpa [#allocation5], 0  ;;  %s2223_s0 = inlined_call_operand.hbm [shape: f32[2,32,256], index: 0, kind: input, shape index: {}]   ;;  %s2224_s1 = inlined_call_operand.vmem [shape: bf16[32,288], index: 1, kind: input, shape index: {}]   ;;  %s2225_s2 = inlined_call_operand.hbm [shape: bf16[8,32], index: 2, kind: input, shape index: {}]   ;;  %s2226_s3 = inlined_call_operand.vmem [shape: f32[32,7], index: 3, kind: input, shape index: {}]   ;;  %s2227_s4 = inlined_call_operand.vmem [shape: f32[8,3], index: 4, kind: input, shape index: {}]   ;;  %s2228_s5 = inlined_call_operand.vmem [shape: f32[1,3], index: 5, kind: input, shape index: {}]   ;;  %s2229_s6 = inlined_call_operand.hbm [shape: f32[2,32,256], index: 6, kind: output, shape index: {}]  }
   0x1   :  { %13 = vsyncpa [#allocation5 + $0x1], 0 }
   0x2   :  { %14 = vsyncpa [#allocation8], 0 }
   0x3   :  { %15 = vsyncpa [#allocation6], 0 }
   0x4   :  { %17 = vsyncpa [#allocation6 + $0x1], 0  ;;  %s1719_s21 = smov 0   ;;  %s1721_s22 = smov 0  }
   0x5   :  { %s1723_s23 = smov 0   ;;  %s1725_s24 = smov 0  }
   0x6 LB: > { %s1740_s25 = sadd.s32 4294967295, %s1663_s24   ;;  %s1384_s26 = sadd.s32 4294967294, %s1663_s24   ;;  %s1663_s24 = sphi %s1725_s24, %s2256_s24   ;;  %s1659_s23 = sphi %s1723_s23, %s2255_s23   ;;  %s1655_s22 = sphi %s1721_s22, %s2254_s22   ;;  %s1651_s21 = sphi %s1719_s21, %s2253_s21  }
   0x7   : > { %s1744_s27 = sadd.s32 1, %s1663_s24   ;;  %s30_s28 = sadd.s32 1, %s1659_s23 }
   0x8   : > { %s27_s29 = ssub.s32 %s1663_s24, %s1744_s27  ;;  %p37_p0 = scmp.ne.s32.totalorder %s1659_s23, %s1655_s22 }
   0x9   : > { %p28_p1 = scmp.eq.s32.totalorder %s27_s29, 0  ;;  %p38_p2 = scmp.eq.s32.totalorder %s1663_s24, 0 }
   0xa   : > { %p43_p3 = scmp.ne.s32.totalorder %s1655_s22, %s1651_s21  ;;  %p2230_p4 = scmp.eq.s32.totalorder %s1740_s25, 0 }
   0xb   : > { %s1756_s30 = scalar_select %p28_p1, %s1659_s23, %s30_s28  }
   0xc   : > { %p1758_p5 = por %p38_p2, %p37_p0  ;;  %p1764_p6 = por %p2230_p4, %p43_p3 }
   0xd   : > { %2235 = sst [smem:[#allocation13_spill]] %s1756_s30  ;;  %p172_p7 = scmp.eq.s32.totalorder %s1740_s25, 1 }
   0xe   : > { %s2237_s8 = scalar_select %p1764_p6, 1, 0 }
   0xf   : > { %p178_p8 = scmp.eq.s32.totalorder %s1384_s26, 1  ;;  %p1385_p9 = scmp.ge.s32.totalorder %s1663_s24, 1 }
  0x10   : > { %p185_p10 = scmp.lt.s32.totalorder %s1663_s24, 3  ;;  %p1771_p11 = por %p172_p7, %p37_p0 }
  0x11   : > { %p1775_p12 = por %p178_p8, %p43_p3  ;;  %s1665_s12 = smov [#allocation7]  }
  0x12   : > { %s2238_s9 = scalar_select %p1771_p11, 1, 0 }
  0x13   : > { %s2239_s10 = scalar_select %p1775_p12, 1, 0 }
  0x14   : > { %p1779_p13 = pnand %p1385_p9, %p185_p10  ;;  %s201_s13 = sshll.u32 %s1665_s12, 4  ;;  %s202_s13 = int_to_ptr.vmem [resolvable:$true] %s201_s13 }
  0x15   : > { %p1440_p4 = scmp.lt.s32.totalorder %s1663_s24, 2  ;;  %p2241_p0 = scmp.eq.s32.totalorder %s1740_s25, 0 }
  0x16   : > { %s2240_s11 = scalar_select %p1779_p13, 1, 0 }
  0x17   : > { %p1427_p2 = pneg %p1779_p13  ;;  %s221_s15 = sand.u32 1, %s1659_s23  }
  0x18   : > { %p1796_p3 = pnand %p1440_p4, %p1758_p5  ;;  %s1388_s17 = sshll.u32 %s221_s15, 6 }
  0x19   : > { %p1789_p7 = pnand %p1427_p2, %p2241_p0  ;;  %s1535_s20 = scalar_lea.hbm %s2225_s2, 64 }
  0x1a   : > { %s2243_s16 = scalar_select %p1796_p3, 1, 0 }
  0x1b   : > { %p1536_p8 = scmp.ne.s32.totalorder %s2225_s2, %s1535_s20  ;;  %p1537_p9 = pneg %p1789_p7 }
  0x1c   : > { %p1542_p4 = scmp.lt.u32.totalorder %s1535_s20, %s2225_s2 }
  0x1d   : > { %p1538_p10 = pnand %p1537_p9, %p1536_p8 }
  0x1f   : > { %p1539_p2 = pneg %p1538_p10 }
  0x21   : > { %p1544_p5 = pnand %p1542_p4, %p1539_p2 }
  0x23   : > { %1547 = shalt.err (!%p1544_p5)
}
  0x24   : > { %s1548_s7 = scalar_lea.vmem %s202_s13, 64  ;;  %p1556_p11 = scmp.lt.s32.totalorder %s202_s13, %s202_s13 }
  0x25   : > { %p1549_p0 = scmp.ne.s32.totalorder %s202_s13, %s1548_s7  ;;  %p1557_p6 = scmp.lt.s32.totalorder %s1548_s7, %s1548_s7 }
  0x27   : > { %p1551_p1 = pnand %p1549_p0, %p1537_p9  ;;  %p1558_p13 = por %p1557_p6, %p1556_p11 }
  0x29   : > { %p1552_p12 = pneg %p1551_p1 }
  0x2b   : > { %p1559_p3 = pnand %p1558_p13, %p1552_p12 }
  0x2d   : > { %1562 = shalt.err (!%p1559_p3)
}
  0x2e   : > { %1430 = dma.hbm_to_vmem [thread:$0]  (!%p1789_p7), %s2225_s2, 64, %s202_s13, [#allocation8]  }
  0x2f   : > { %s1409_s20 = sshll.u32 %s1663_s24, 10  ;;  %s225_s26 = scalar_lea.vmem [#allocation4], %s1388_s17 }
  0x30   : > { %s232_s28 = sshll.u32 %s225_s26, 4  ;;  %s1820_s30 = scalar_lea.hbm %s2223_s0, %s1409_s20  ;;  %s1822_s28 = int_to_ptr.vmem [resolvable:$true] %s232_s28 }
  0x31   : > { %s1824_s14 = scalar_lea.sflag [#allocation5], %s221_s15  ;;  %s1563_s7 = scalar_lea.hbm %s1820_s30, 1024 }
  0x32   : > { %p1564_p6 = scmp.ne.s32.totalorder %s1820_s30, %s1563_s7  ;;  %p2244_p11 = scmp.ne.s32.totalorder %s2243_s16, 0 }
  0x33   : > { %s1568_s18 = scalar_lea.hbm %s2223_s0, 2048  ;;  %p1569_p7 = scmp.lt.u32.totalorder %s1820_s30, %s2223_s0 }
  0x34   : > { %p1565_p12 = pneg %p2244_p11  ;;  %p1570_p3 = scmp.lt.u32.totalorder %s1568_s18, %s1563_s7 }
  0x35   : > { %p1572_p9 = scmp.lt.u32.totalorder %s1563_s7, %s1820_s30 }
  0x36   : > { %p1566_p13 = pnand %p1565_p12, %p1564_p6  ;;  %p1571_p8 = por %p1570_p3, %p1569_p7 }
  0x38   : > { %p1567_p1 = pneg %p1566_p13  ;;  %p1573_p10 = por %p1572_p9, %p1571_p8 }
  0x3a   : > { %p1574_p2 = pnand %p1573_p10, %p1567_p1 }
  0x3c   : > { %1577 = shalt.err (!%p1574_p2)
}
  0x3d   : > { %s1578_s15 = scalar_lea.vmem %s1822_s28, 1024  ;;  %s1666_s26 = smov [#allocation4]  }
  0x3e   : > { %p1579_p4 = scmp.ne.s32.totalorder %s1822_s28, %s1578_s15  ;;  %s1583_s29 = sshll.u32 %s1666_s26, 4  ;;  %s1584_s29 = int_to_ptr.vmem [resolvable:$false] %s1583_s29 }
  0x3f   : > { %s1585_s12 = scalar_lea.vmem %s1584_s29, 2048  ;;  %p1586_p6 = scmp.lt.s32.totalorder %s1822_s28, %s1584_s29 }
  0x40   : > { %p1581_p5 = pnand %p1579_p4, %p1565_p12  ;;  %p1587_p13 = scmp.lt.s32.totalorder %s1585_s12, %s1578_s15 }
  0x42   : > { %p1582_p0 = pneg %p1581_p5  ;;  %p1588_p7 = por %p1587_p13, %p1586_p6 }
  0x44   : > { %p1589_p3 = pnand %p1588_p7, %p1582_p0 }
  0x46   : > { %1592 = shalt.err (!%p1589_p3)
}
  0x47   : > { %s1667_s7 = smov 256   ;;  %s1668_s13 = smov 16  }
  0x48   : > { %1434 = dma.hbm_to_vmem [thread:$0]  (!%p2244_p11), %s1820_s30, 1024, %s1822_s28, %s1824_s14, %s1667_s7, %s1667_s7, %s1668_s13  }
  0x49   : > { %p2245_p12 = scmp.ne.s32.totalorder %s2240_s11, 0 }
  0x4a   : > { %s1855_s17 = sand.u32 (!%p2245_p12), 1, %s1655_s22   ;;  %p2246_p1 = scmp.ne.s32.totalorder (!%p2245_p12), %s2237_s8, 0 }
  0x4b   : > { %244 = sbr.rel (%p2245_p12) target bundleno = 1382 (0x566), region = 44  ;;  %s1392_s18 = sshll.u32 (!%p2245_p12), %s1855_s17, 6 }
  0x4c   : > { %s247_s19 = scalar_lea.sflag (!%p2245_p12), [#allocation5], %s1855_s17  ;;  %s1861_s20 = scalar_lea.vmem (!%p2245_p12), [#allocation4], %s1392_s18 }
  0x52   : > { %1638 = dma.done.wait (%p2246_p1), %s247_s19, 1024  }
  0x53   : > { %1640 = vsyncadd (%p2246_p1), %s247_s19, 4294966272  ;;  %v317_v0 = vlaneseq  ;;  %p2247_p11 = scmp.eq.s32.totalorder %s1740_s25, 0 }
  0x55   : > { %1642 = dma.done.wait (%p2247_p11), [#allocation8], 64   ;;  %p2248_p8 = pmov %p2247_p11 }
  0x56   : > { %v1669_v1 = vmov 0   ;;  %v318_v2 = vand.u32 127, %v317_v0  ;;  %v365_v5 = vshrl.u32 %v317_v0, 7  ;;  %v302_v9 = vld [vmem:[%s1861_s20 + $0x8] sm:$0xff]  ;;  %v304_v10 = vld [vmem:[%s1861_s20 + $0x18] sm:$0xff]  ;;  %v301_v11 = vld [vmem:[%s1861_s20] sm:$0xff] }
  0x57   : > { %1644 = vsyncadd (%p2248_p8), [#allocation8], 4294967232  ;;  %942 = vmatprep.mubr.bf16.mxu1 %v1669_v1  ;;  %1493 = vset.pattern.permute.xlu1 %v1669_v1  ;;  %v303_v14 = vld [vmem:[%s1861_s20 + $0x10] sm:$0xff]  ;;  %v305_v15 = vld [vmem:[%s1861_s20 + $0x20] sm:$0xff]  ;;  %v1881_v17 = vpack.c.bf16 %v304_v10, %v302_v9  ;;  %s1670_s30 = smov 111   ;;  %s1671_s8 = smov 113  }
  0x58   : > { %1492 = vset.pattern.permute.xlu0 %v1669_v1  ;;  %v319_v3 = vadd.s32 128, %v318_v2  ;;  %v324_v4 = vand.u32 15, %v318_v2  ;;  %v1879_v16 = vsub.s32 0, %v365_v5  ;;  %v1883_v18 = vpack.c.bf16 %v303_v14, %v301_v11  ;;  %v307_v19 = vld [vmem:[%s1861_s20 + $0x30] sm:$0xff]  ;;  %v306_v20 = vld [vmem:[%s1861_s20 + $0x28] sm:$0xff]  ;;  %v308_v21 = vld [vmem:[%s1861_s20 + $0x38] sm:$0xff] }
  0x59   : > { %v1888_v22 = vpack.c.bf16 %v307_v19, %v305_v15  ;;  %v1890_v23 = vpack.c.bf16 %v308_v21, %v306_v20  ;;  %v370_v24 = vsub.s32 4, %v365_v5  ;;  %s1672_s11 = smov 127   ;;  %vm295_vm6 = vcmask 146432   ;;  %s1673_s16 = smov 1  }
  0x5a   : > { %v331_v6 = vand.u32 15, %v319_v3  ;;  %v350_v7 = vadd.s32 4294967295, %v324_v4  ;;  %v461_v8 = vadd.s32 1, %v324_v4  ;;  %296 = vst.msk [vmem:[#allocation2 + $0x18] sm:$0xff] %vm295_vm6, %v1669_v1  ;;  %300 = vst.msk [vmem:[#allocation2 + $0x38] sm:$0xff] %vm295_vm6, %v1669_v1  ;;  %s1674_s28 = smov 15  }
  0x5b   : > { %s1675_s14 = smov 17   ;;  %s1676_s15 = smov 16   ;;  %vm376_vm8 = vcmask 908288   ;;  %vm487_vm12 = vcmask 924672   ;;  %vm516_vm6 = vcmask 121856  }
  0x5c   : > { %v351_v12 = vadd.s32 4294967295, %v331_v6  ;;  %vm352_vm0 = vcmp.ge.s32.totalorder %v350_v7, 0  ;;  %v462_v13 = vadd.s32 1, %v331_v6  ;;  %vm465_vm1 = vcmp.lt.s32.totalorder %v461_v8, 16  ;;  %s1677_s26 = smov 112   ;;  %s282_s29 = scalar_lea.vmem [#allocation9], %s1392_s18 }
  0x5d   : > { %s1410_s12 = sshll.u32 %s1740_s25, 10  ;;  %s1301_s7 = sshll.u32 %s282_s29, 4  ;;  %s2178_s7 = int_to_ptr.vmem [resolvable:$true] %s1301_s7 }
  0x5e   : > { %vm353_vm2 = vcmp.ge.s32.totalorder %v351_v12, 0  ;;  %vm466_vm3 = vcmp.lt.s32.totalorder %v462_v13, 16  ;;  %v1505_v13 = vld [vmem:[%s2224_s1 + $0x4] ss:$12 sps:$4 sm:$0xff]   ;;  %s2176_s25 = scalar_lea.hbm %s2229_s6, %s1410_s12  ;;  %s1288_s19 = scalar_lea.sflag [#allocation6], %s1855_s17 }
  0x5f   : > { %vm362_vm4 = vmpackc.low %vm353_vm2, %vm352_vm0  ;;  %vm539_vm0 = vcmask 1039360   ;;  %889 = vmatprep.mubr.bf16.mxu0 %v1505_v13  ;;  %s1593_s20 = scalar_lea.vmem %s2178_s7, 1024  ;;  %p2249_p10 = scmp.ne.s32.totalorder %s2238_s9, 0 }
  0x60   : > { %v363_v25 = vsel %vm362_vm4, 65537, %v1669_v1  ;;  %vm473_vm5 = vmpackc.low %vm466_vm3, %vm465_vm1  ;;  %vm568_vm4 = vcmask 7168   ;;  %p1594_p9 = scmp.ne.s32.totalorder %s2178_s7, %s1593_s20 }
  0x61   : > { %v367_v26 = vrot.slane %v363_v25, %v1879_v16  ;;  %v474_v27 = vsel %vm473_vm5, 65537, %v1669_v1  ;;  %v371_v29 = vrot.slane %v363_v25, %v370_v24  ;;  %v591_v50 = vld [vmem:[#allocation2 + $0x18] sm:$0xff]  ;;  %v2029_v25 = vld [vmem:[%s2226_s3 + $0x8] sm:$0xff] }
  0x62   : > { %v478_v28 = vrot.slane %v474_v27, %v1879_v16  ;;  %v482_v30 = vrot.slane %v474_v27, %v370_v24  ;;  %v594_v53 = vld [vmem:[#allocation2 + $0x38] sm:$0xff]  ;;  %v2022_v24 = vld [vmem:[%s2226_s3] sm:$0xff]  ;;  %v2035_v27 = vld [vmem:[%s2226_s3 + $0x10] sm:$0xff]  ;;  %p1595_p2 = pnand %p1594_p9, %p2249_p10 }
  0x63   : > { %372 = vrot.lane.b32.xlu0 %v367_v26, %s1670_s30 }
  0x64   : > { %483 = vrot.lane.b32.xlu1 %v478_v28, %s1671_s8  ;;  %p1596_p4 = pneg %p1595_p2 }
  0x67   : > { %374 = vrot.lane.b32.xlu0 %v371_v29, %s1670_s30 }
  0x68   : > { %485 = vrot.lane.b32.xlu1 %v482_v30, %s1671_s8 }
  0x6b   : > { %535 = vrot.lane.b32.xlu0 %v367_v26, %s1672_s11 }
  0x6c   : > { %537 = vrot.lane.b32.xlu1 %v371_v29, %s1672_s11 }
  0x6f   : > { %595 = vrot.lane.b32.xlu0 %v478_v28, %s1673_s16 }
  0x70   : > { %597 = vrot.lane.b32.xlu1 %v482_v30, %s1673_s16 }
  0x73   : > { %645 = vrot.lane.b32.xlu0 %v367_v26, %s1674_s28  ;;  %v1678_v26 = vmov 1  }
  0x74   : > { %647 = vrot.lane.b32.xlu1 %v371_v29, %s1674_s28  ;;  %v2044_v29 = vld [vmem:[%s2226_s3 + $0x18] sm:$0xff] }
  0x77   : > { %732 = vrot.lane.b32.xlu0 %v478_v28, %s1675_s14 }
  0x78   : > { %734 = vrot.lane.b32.xlu1 %v482_v30, %s1675_s14 }
  0x7b   : > { %432 = vrot.lane.b32.xlu0 %v1883_v18, %s1676_s15 }
  0x7c   : > { %434 = vrot.lane.b32.xlu1 %v1881_v17, %s1676_s15 }
  0x7f   : > { %430 = vrot.lane.b32.xlu0 %v1669_v1, %s1676_s15 }
  0x80   : > { %438 = vrot.lane.b32.xlu1 %v1888_v22, %s1676_s15 }
  0x83   : > { %440 = vrot.lane.b32.xlu0 %v1890_v23, %s1676_s15 }
  0x84   : > { %436 = vrot.lane.b32.xlu1 %v1669_v1, %s1676_s15 }
  0x87   : > { %393 = vrot.lane.b32.xlu0 %v1669_v1, %s1675_s14 }
  0xd5   : > { %v373_v31 = vpop.permute.xlu0 %372 }
  0xd6   : > { %v484_v32 = vpop.permute.xlu1 %483 }
  0xd9   : > { %v375_v33 = vpop.permute.xlu0 %374 }
  0xda   : > { %vm380_vm7 = vcmp.ne.s16.totalorder %v375_v33, 0  ;;  %v486_v36 = vpop.permute.xlu1 %485  ;;  %v377_v37 = vsel %vm376_vm8, %v373_v31, %v375_v33 }
  0xdb   : > { %v383_v34 = vsel %vm380_vm7, %v1881_v17, 0  ;;  %v386_v35 = vsel %vm380_vm7, %v1890_v23, 0  ;;  %vm491_vm9 = vcmp.ne.s16.totalorder %v486_v36, 0  ;;  %vm379_vm10 = vcmp.ne.s16.totalorder %v377_v37, 0 }
  0xdc   : > { %397 = vrot.lane.b32.xlu1 %v383_v34, %s1675_s14  ;;  %403 = vrot.lane.b32.xlu0 %v386_v35, %s1675_s14  ;;  %v494_v38 = vsel %vm491_vm9, %v1881_v17, 0  ;;  %v497_v39 = vsel %vm491_vm9, %v1890_v23, 0  ;;  %v382_v42 = vsel %vm379_vm10, %v1883_v18, 0  ;;  %v385_v45 = vsel %vm379_vm10, %v1888_v22, 0 }
  0xdd   : > { %v536_v41 = vpop.permute.xlu0 %535  ;;  %v488_v48 = vsel %vm487_vm12, %v484_v32, %v486_v36  ;;  %vm405_vm10 = vcmask 138240  }
  0xde   : > { %v538_v40 = vpop.permute.xlu1 %537  ;;  %vm490_vm15 = vcmp.ne.s16.totalorder %v488_v48, 0 }
  0xdf   : > { %vm543_vm11 = vcmp.ne.s16.totalorder %v538_v40, 0  ;;  %v493_v52 = vsel %vm490_vm15, %v1883_v18, 0  ;;  %v540_v54 = vsel %vm539_vm0, %v536_v41, %v538_v40  ;;  %v496_v59 = vsel %vm490_vm15, %v1888_v22, 0 }
  0xe0   : > { %399 = vrot.lane.b32.xlu1 %v1669_v1, %s1675_s14  ;;  %504 = vrot.lane.b32.xlu0 %v1669_v1, %s1674_s28  ;;  %v546_v43 = vsel %vm543_vm11, %v1881_v17, 0  ;;  %v549_v46 = vsel %vm543_vm11, %v1890_v23, 0  ;;  %vm542_vm1 = vcmp.ne.s16.totalorder %v540_v54, 0  ;;  %vm713_vm15 = vcmask 916480  }
  0xe1   : > { %v596_v44 = vpop.permute.xlu0 %595  ;;  %v545_v60 = vsel %vm542_vm1, %v1883_v18, 0  ;;  %v548_v63 = vsel %vm542_vm1, %v1888_v22, 0 }
  0xe2   : > { %vm600_vm13 = vcmp.ne.s16.totalorder %v596_v44, 0  ;;  %v598_v47 = vpop.permute.xlu1 %597 }
  0xe3   : > { %v603_v49 = vsel %vm600_vm13, %v1883_v18, 0  ;;  %vm602_vm14 = vcmp.ne.s16.totalorder %v598_v47, 0  ;;  %v606_v55 = vsel %vm600_vm13, %v1888_v22, 0  ;;  %v599_v2 = vsel %vm568_vm4, %v596_v44, %v598_v47 }
  0xe4   : > { %508 = vrot.lane.b32.xlu1 %v494_v38, %s1674_s28  ;;  %514 = vrot.lane.b32.xlu0 %v497_v39, %s1674_s28  ;;  %v605_v51 = vsel %vm602_vm14, %v591_v50, 0  ;;  %v608_v56 = vsel %vm602_vm14, %v594_v53, 0  ;;  %vm601_vm5 = vcmp.ne.s16.totalorder %v599_v2, 0  ;;  %vm442_vm14 = vcmask 130048  }
  0xe5   : > { %v646_v58 = vpop.permute.xlu0 %645  ;;  %v604_v5 = vsel %vm601_vm5, %v1881_v17, 0  ;;  %v607_v9 = vsel %vm601_vm5, %v1890_v23, 0 }
  0xe6   : > { %v648_v57 = vpop.permute.xlu1 %647  ;;  %vm650_vm3 = vcmp.ne.s16.totalorder %v646_v58, 0 }
  0xe7   : > { %vm652_vm2 = vcmp.ne.s16.totalorder %v648_v57, 0  ;;  %v653_v62 = vsel %vm650_vm3, %v1883_v18, 0  ;;  %v656_v3 = vsel %vm650_vm3, %v1888_v22, 0  ;;  %v649_v6 = vsel %vm516_vm6, %v646_v58, %v648_v57 }
  0xe8   : > { %510 = vrot.lane.b32.xlu1 %v1669_v1, %s1674_s28  ;;  %395 = vrot.lane.b32.xlu0 %v382_v42, %s1675_s14  ;;  %v655_v61 = vsel %vm652_vm2, %v591_v50, 0  ;;  %v658_v0 = vsel %vm652_vm2, %v594_v53, 0  ;;  %vm651_vm9 = vcmp.ne.s16.totalorder %v649_v6, 0 }
  0xe9   : > { %v733_v8 = vpop.permute.xlu0 %732  ;;  %v654_v10 = vsel %vm651_vm9, %v1881_v17, 0  ;;  %v657_v14 = vsel %vm651_vm9, %v1890_v23, 0 }
  0xea   : > { %v735_v4 = vpop.permute.xlu1 %734  ;;  %vm737_vm11 = vcmp.ne.s16.totalorder %v733_v8, 0 }
  0xeb   : > { %vm739_vm7 = vcmp.ne.s16.totalorder %v735_v4, 0  ;;  %v736_v11 = vsel %vm405_vm10, %v733_v8, %v735_v4  ;;  %v740_v12 = vsel %vm737_vm11, %v1883_v18, 0  ;;  %v743_v21 = vsel %vm737_vm11, %v1888_v22, 0 }
  0xec   : > { %560 = vrot.lane.b32.xlu1 %v546_v43, %s1673_s16  ;;  %556 = vrot.lane.b32.xlu0 %v1669_v1, %s1673_s16  ;;  %v742_v7 = vsel %vm739_vm7, %v591_v50, 0  ;;  %vm738_vm13 = vcmp.ne.s16.totalorder %v736_v11, 0  ;;  %v745_v20 = vsel %vm739_vm7, %v594_v53, 0 }
  0xed   : > { %v741_v15 = vsel %vm738_vm13, %v1881_v17, 0  ;;  %v744_v19 = vsel %vm738_vm13, %v1890_v23, 0  ;;  %v433_v28 = vpop.permute.xlu0 %432 }
  0xee   : > { %v435_v30 = vpop.permute.xlu1 %434 }
  0xf0   : > { %401 = vrot.lane.b32.xlu1 %v385_v45, %s1675_s14  ;;  %566 = vrot.lane.b32.xlu0 %v549_v46, %s1673_s16 }
  0xf1   : > { %v431_v31 = vpop.permute.xlu0 %430 }
  0xf2   : > { %v439_v32 = vpop.permute.xlu1 %438 }
  0xf4   : > { %562 = vrot.lane.b32.xlu1 %v1669_v1, %s1673_s16  ;;  %615 = vrot.lane.b32.xlu0 %v603_v49, %s1672_s11 }
  0xf5   : > { %v441_v33 = vpop.permute.xlu0 %440 }
  0xf6   : > { %v437_v34 = vpop.permute.xlu1 %436 }
  0xf8   : > { %619 = vrot.lane.b32.xlu1 %v605_v51, %s1672_s11  ;;  %506 = vrot.lane.b32.xlu0 %v493_v52, %s1674_s28  ;;  %v444_v52 = vsel %vm442_vm14, %v433_v28, %v435_v30 }
  0xf9   : > { %v394_v35 = vpop.permute.xlu0 %393 }
  0xfc   : > { %621 = vrot.lane.b32.xlu1 %v606_v55, %s1672_s11  ;;  %625 = vrot.lane.b32.xlu0 %v608_v56, %s1672_s11  ;;  %v443_v55 = vsel %vm442_vm14, %v431_v31, %v433_v28  ;;  %v446_v56 = vsel %vm442_vm14, %v439_v32, %v441_v33 }
 0x100   : > { %512 = vrot.lane.b32.xlu1 %v496_v59, %s1674_s28  ;;  %558 = vrot.lane.b32.xlu0 %v545_v60, %s1673_s16  ;;  %v445_v59 = vsel %vm442_vm14, %v437_v34, %v439_v32  ;;  %s1680_s28 = smov 123  }
 0x104   : > { %669 = vrot.lane.b32.xlu1 %v655_v61, %s1671_s8  ;;  %665 = vrot.lane.b32.xlu0 %v653_v62, %s1671_s8 }
 0x108   : > { %564 = vrot.lane.b32.xlu1 %v548_v63, %s1673_s16  ;;  %675 = vrot.lane.b32.xlu0 %v658_v0, %s1671_s8  ;;  %s1679_s16 = smov 2  }
 0x10c   : > { %671 = vrot.lane.b32.xlu1 %v656_v3, %s1671_s8  ;;  %703 = vrot.lane.b32.xlu0 %v1881_v17, %s1677_s26 }
 0x110   : > { %705 = vrot.lane.b32.xlu1 %v591_v50, %s1677_s26  ;;  %617 = vrot.lane.b32.xlu0 %v604_v5, %s1672_s11 }
 0x114   : > { %756 = vrot.lane.b32.xlu1 %v742_v7, %s1670_s30  ;;  %701 = vrot.lane.b32.xlu0 %v1883_v18, %s1677_s26 }
 0x118   : > { %623 = vrot.lane.b32.xlu1 %v607_v9, %s1672_s11  ;;  %667 = vrot.lane.b32.xlu0 %v654_v10, %s1671_s8 }
 0x11c   : > { %752 = vrot.lane.b32.xlu1 %v740_v12, %s1670_s30  ;;  %709 = vrot.lane.b32.xlu0 %v1890_v23, %s1677_s26 }
 0x120   : > { %673 = vrot.lane.b32.xlu1 %v657_v14, %s1671_s8  ;;  %754 = vrot.lane.b32.xlu0 %v741_v15, %s1670_s30  ;;  %s1682_s8 = smov [#allocation9]  }
 0x121   : > { %s1597_s11 = sshll.u32 %s1682_s8, 4  ;;  %s1598_s11 = int_to_ptr.vmem [resolvable:$false] %s1597_s11 }
 0x122   : > { %p1600_p5 = scmp.lt.s32.totalorder %s2178_s7, %s1598_s11 }
 0x124   : > { %711 = vrot.lane.b32.xlu1 %v594_v53, %s1677_s26  ;;  %760 = vrot.lane.b32.xlu0 %v744_v19, %s1670_s30 }
 0x128   : > { %762 = vrot.lane.b32.xlu1 %v745_v20, %s1670_s30  ;;  %707 = vrot.lane.b32.xlu0 %v1888_v22, %s1677_s26 }
 0x12c   : > { %758 = vrot.lane.b32.xlu1 %v743_v21, %s1670_s30  ;;  %965 = vperm.xlu0 %1492, %v2022_v24   ;;  %s1599_s30 = scalar_lea.vmem %s1598_s11, 2048 }
 0x12d   : > { %p1601_p0 = scmp.lt.s32.totalorder %s1599_s30, %s1593_s20 }
 0x12f   : > { %p1602_p6 = por %p1601_p0, %p1600_p5 }
 0x130   : > { %970 = vperm.xlu1 %1493, %v2029_v25   ;;  %1494 = vset.pattern.permute.xlu0 %v1678_v26 }
 0x131   : > { %992 = vperm.xlu0 %1494, %v2022_v24   ;;  %p1603_p13 = pnand %p1602_p6, %p1596_p4 }
 0x134   : > { %975 = vperm.xlu1 %1493, %v2035_v27  }
 0x135   : > { %1000 = vperm.xlu0 %1494, %v2035_v27  }
 0x138   : > { %1495 = vset.pattern.permute.xlu1 %v1678_v26 }
 0x139   : > { %996 = vperm.xlu1 %1495, %v2029_v25  }
 0x13d   : > { %1496 = vset.pattern.permute.xlu1 %v1669_v1 }
 0x13e   : > { %980 = vperm.xlu1 %1496, %v2044_v29  }
 0x142   : > { %1497 = vset.pattern.permute.xlu1 %v1678_v26 }
 0x143   : > { %1004 = vperm.xlu1 %1497, %v2044_v29  }
 0x147   : > { %1498 = vset.pattern.permute.xlu1 %v1669_v1 }
 0x14e   : > { %v398_v36 = vpop.permute.xlu1 %397  ;;  %v404_v37 = vpop.permute.xlu0 %403 }
 0x152   : > { %v400_v38 = vpop.permute.xlu1 %399  ;;  %v505_v39 = vpop.permute.xlu0 %504 }
 0x156   : > { %v509_v40 = vpop.permute.xlu1 %508  ;;  %v515_v41 = vpop.permute.xlu0 %514 }
 0x15a   : > { %v511_v42 = vpop.permute.xlu1 %510  ;;  %v396_v43 = vpop.permute.xlu0 %395 }
 0x15b   : > { %v407_v44 = vsel %vm405_vm10, %v396_v43, %v398_v36  ;;  %v406_v45 = vsel %vm405_vm10, %v394_v35, %v396_v43 }
 0x15c   : > { %857 = vmatprep.subr.bf16.mxu0 %v407_v44 }
 0x15d   : > { %858 = vmatpush1.bf16.msra.mxu0 %v406_v45 }
 0x15e   : > { %v561_v46 = vpop.permute.xlu1 %560  ;;  %v557_v47 = vpop.permute.xlu0 %556 }
 0x162   : > { %v402_v48 = vpop.permute.xlu1 %401  ;;  %v567_v49 = vpop.permute.xlu0 %566 }
 0x163   : > { %v409_v50 = vsel %vm405_vm10, %v402_v48, %v404_v37  ;;  %v408_v51 = vsel %vm405_vm10, %v400_v38, %v402_v48 }
 0x164   : > { %859 = vmatprep.subr.bf16.mxu0 %v409_v50  ;;  %v1507_v50 = vld [vmem:[%s2224_s1 + $0x1c] ss:$12 sps:$4 sm:$0xff]  }
 0x165   : > { %860 = vmatpush1.bf16.msra.mxu0 %v408_v51 }
 0x166   : > { %v563_v53 = vpop.permute.xlu1 %562  ;;  %861 = vmatprep.subr.bf16.mxu0 %v444_v52  ;;  %v616_v54 = vpop.permute.xlu0 %615 }
 0x169   : > { %862 = vmatpush1.bf16.msra.mxu0 %v443_v55  ;;  %v1510_v55 = vld [vmem:[%s2224_s1 + $0x20] ss:$12 sps:$4 sm:$0xff]  }
 0x16a   : > { %v620_v57 = vpop.permute.xlu1 %619  ;;  %863 = vmatprep.subr.bf16.mxu0 %v446_v56  ;;  %v507_v58 = vpop.permute.xlu0 %506 }
 0x16b   : > { %v518_v60 = vsel %vm516_vm6, %v507_v58, %v509_v40  ;;  %v517_v63 = vsel %vm516_vm6, %v505_v39, %v507_v58 }
 0x16d   : > { %864 = vmatpush1.bf16.msra.mxu0 %v445_v59 }
 0x16e   : > { %v622_v61 = vpop.permute.xlu1 %621  ;;  %865 = vmatprep.subr.bf16.mxu0 %v518_v60  ;;  %v626_v62 = vpop.permute.xlu0 %625 }
 0x171   : > { %866 = vmatpush1.bf16.msra.mxu0 %v517_v63 }
 0x172   : > { %v513_v0 = vpop.permute.xlu1 %512  ;;  %v559_v2 = vpop.permute.xlu0 %558 }
 0x173   : > { %v520_v3 = vsel %vm516_vm6, %v513_v0, %v515_v41  ;;  %v519_v4 = vsel %vm516_vm6, %v511_v42, %v513_v0  ;;  %v570_v5 = vsel %vm568_vm4, %v559_v2, %v561_v46  ;;  %v569_v8 = vsel %vm568_vm4, %v557_v47, %v559_v2 }
 0x174   : > { %867 = vmatprep.subr.bf16.mxu0 %v520_v3 }
 0x175   : > { %868 = vmatpush1.bf16.msra.mxu0 %v519_v4 }
 0x176   : > { %v670_v6 = vpop.permute.xlu1 %669  ;;  %869 = vmatprep.subr.bf16.mxu0 %v570_v5  ;;  %v666_v7 = vpop.permute.xlu0 %665 }
 0x179   : > { %870 = vmatpush1.bf16.msra.mxu0 %v569_v8 }
 0x17a   : > { %v565_v9 = vpop.permute.xlu1 %564  ;;  %v676_v10 = vpop.permute.xlu0 %675 }
 0x17b   : > { %v572_v11 = vsel %vm568_vm4, %v565_v9, %v567_v49  ;;  %v571_v12 = vsel %vm568_vm4, %v563_v53, %v565_v9  ;;  %v1503_v49 = vld [vmem:[%s2224_s1] ss:$12 sps:$4 sm:$0xff]   ;;  %v1506_v53 = vld [vmem:[%s2224_s1 + $0x8] ss:$12 sps:$4 sm:$0xff]  }
 0x17c   : > { %871 = vmatprep.subr.bf16.mxu0 %v572_v11 }
 0x17d   : > { %872 = vmatpush1.bf16.msra.mxu0 %v571_v12 }
 0x17e   : > { %v672_v13 = vpop.permute.xlu1 %671  ;;  %v704_v14 = vpop.permute.xlu0 %703  ;;  %873 = vmatprep.subr.bf16.mxu0 %v1881_v17 }
 0x181   : > { %874 = vmatpush1.bf16.msra.mxu0 %v1883_v18 }
 0x182   : > { %v706_v15 = vpop.permute.xlu1 %705  ;;  %v618_v19 = vpop.permute.xlu0 %617  ;;  %875 = vmatprep.subr.bf16.mxu0 %v1890_v23 }
 0x183   : > { %v628_v20 = vsel %vm539_vm0, %v618_v19, %v620_v57  ;;  %v627_v28 = vsel %vm539_vm0, %v616_v54, %v618_v19  ;;  %v715_v40 = vsel %vm713_vm15, %v704_v14, %v706_v15  ;;  %v1509_v54 = vld [vmem:[%s2224_s1 + $0x18] ss:$12 sps:$4 sm:$0xff]  }
 0x185   : > { %876 = vmatpush1.bf16.msra.mxu0 %v1888_v22 }
 0x186   : > { %v757_v21 = vpop.permute.xlu1 %756  ;;  %877 = vmatprep.subr.bf16.mxu0 %v628_v20  ;;  %v702_v26 = vpop.permute.xlu0 %701 }
 0x187   : > { %v714_v43 = vsel %vm713_vm15, %v702_v26, %v704_v14 }
 0x189   : > { %878 = vmatpush1.bf16.msra.mxu0 %v627_v28 }
 0x18a   : > { %v624_v30 = vpop.permute.xlu1 %623  ;;  %v668_v31 = vpop.permute.xlu0 %667 }
 0x18b   : > { %v630_v17 = vsel %vm539_vm0, %v624_v30, %v626_v62  ;;  %v629_v18 = vsel %vm539_vm0, %v622_v61, %v624_v30  ;;  %v678_v23 = vsel %vm487_vm12, %v668_v31, %v670_v6  ;;  %v677_v33 = vsel %vm487_vm12, %v666_v7, %v668_v31 }
 0x18c   : > { %879 = vmatprep.subr.bf16.mxu0 %v630_v17  ;;  %vm1200_vm0 = vcmask 15360  }
 0x18d   : > { %880 = vmatpush1.bf16.msra.mxu0 %v629_v18 }
 0x18e   : > { %v753_v32 = vpop.permute.xlu1 %752  ;;  %881 = vmatprep.subr.bf16.mxu0 %v678_v23  ;;  %v710_v22 = vpop.permute.xlu0 %709 }
 0x191   : > { %882 = vmatpush1.bf16.msra.mxu0 %v677_v33 }
 0x192   : > { %v674_v34 = vpop.permute.xlu1 %673  ;;  %v755_v35 = vpop.permute.xlu0 %754 }
 0x193   : > { %v680_v36 = vsel %vm487_vm12, %v674_v34, %v676_v10  ;;  %v765_v37 = vsel %vm376_vm8, %v755_v35, %v757_v21  ;;  %v679_v38 = vsel %vm487_vm12, %v672_v13, %v674_v34  ;;  %v764_v39 = vsel %vm376_vm8, %v753_v32, %v755_v35 }
 0x194   : > { %883 = vmatprep.subr.bf16.mxu0 %v680_v36  ;;  %910 = vmatprep.subr.bf16.mxu1 %v765_v37  ;;  %vm850_vm12 = vcmask 261120  }
 0x195   : > { %884 = vmatpush1.bf16.msra.mxu0 %v679_v38  ;;  %911 = vmatpush1.bf16.msra.mxu1 %v764_v39 }
 0x196   : > { %v712_v41 = vpop.permute.xlu1 %711  ;;  %885 = vmatprep.subr.bf16.mxu0 %v715_v40  ;;  %v761_v42 = vpop.permute.xlu0 %760 }
 0x197   : > { %v717_v44 = vsel %vm713_vm15, %v710_v22, %v712_v41 }
 0x199   : > { %886 = vmatpush1.bf16.msra.mxu0 %v714_v43 }
 0x19a   : > { %v763_v45 = vpop.permute.xlu1 %762  ;;  %887 = vmatprep.subr.bf16.mxu0 %v717_v44  ;;  %v708_v46 = vpop.permute.xlu0 %707 }
 0x19b   : > { %v767_v47 = vsel %vm376_vm8, %v761_v42, %v763_v45  ;;  %v716_v48 = vsel %vm713_vm15, %v708_v46, %v710_v22 }
 0x19c   : > { %912 = vmatprep.subr.bf16.mxu1 %v767_v47 }
 0x19d   : > { %888 = vmatpush1.bf16.msra.mxu0 %v716_v48 }
 0x19e   : > { %v759_v51 = vpop.permute.xlu1 %758 }
 0x19f   : > { %v766_v52 = vsel %vm376_vm8, %v759_v51, %v761_v42  ;;  %vm1149_vm8 = vcmask 39960  }
 0x1a0   : > { %890 = vmatmul.mubr.bf16.vlgmr.msra.gmra.mrb[0].mxu0 %v1503_v49  ;;  %913 = vmatpush1.bf16.msra.mxu1 %v766_v52 }
 0x1a1   : > { %899 = vmatprep.mubr.bf16.mxu0 %v1507_v50 }
 0x1a3   : > { %1401 = vmatmul.mubr.msk.bf16.vlgmr.msra.gmra.mrb[0].mxu1 %vm850_vm12, %v1506_v53 }
 0x1a4   : > { %952 = vmatprep.mubr.bf16.mxu1 %v1669_v1 }
 0x1a8   : > { %900 = vmatmul.mubr.bf16.gmra.mrb[4].mxu0 %v1509_v54 }
 0x1ab   : > { %1402 = vmatmul.mubr.msk.bf16.gmra.mrb[4].mxu1 %vm850_vm12, %v1510_v55  ;;  %v966_v58 = vpop.permute.xlu0 %965 }
 0x1ac   : > { %1063 = vmatprep.mubr.bf16.mxu1 %v1669_v1 }
 0x1af   : > { %v971_v56 = vpop.permute.xlu1 %970 }
 0x1b0   : > { %v993_v6 = vpop.permute.xlu0 %992 }
 0x1b3   : > { %v976_v57 = vpop.permute.xlu1 %975 }
 0x1b4   : > { %v1001_v42 = vpop.permute.xlu0 %1000 }
 0x1b8   : > { %v997_v62 = vpop.permute.xlu1 %996 }
 0x1bd   : > { %v981_v21 = vpop.permute.xlu1 %980 }
 0x1c2   : > { %v1005_v45 = vpop.permute.xlu1 %1004 }
 0x273   : > { %v891_v59 = vpop.f32.mrb[0].mxu0 }
 0x274   : > { %v893_v60 = vpop.f32.mrb[1].mxu0 }
 0x275   : > { %v895_v61 = vpop.f32.mrb[2].mxu0 }
 0x276   : > { %v897_v63 = vpop.f32.mrb[3].mxu0  ;;  %v944_v0 = vpop.f32.mrb[0].mxu1 }
 0x277   : > { %v945_v2 = vadd.f32 %v944_v0, %v891_v59  ;;  %v946_v3 = vpop.f32.mrb[1].mxu1 }
 0x278   : > { %v947_v4 = vadd.f32 %v946_v3, %v893_v60  ;;  %v948_v5 = vpop.f32.mrb[2].mxu1 }
 0x279   : > { %v983_v7 = vmul.f32 %v966_v58, %v945_v2  ;;  %v949_v8 = vadd.f32 %v948_v5, %v895_v61  ;;  %v950_v9 = vpop.f32.mrb[3].mxu1 }
 0x27a   : > { %v984_v10 = vmul.f32 %v966_v58, %v947_v4  ;;  %v951_v11 = vadd.f32 %v950_v9, %v897_v63 }
 0x27b   : > { %v985_v12 = vmul.f32 %v971_v56, %v949_v8  ;;  %v1007_v13 = vadd.f32 %v993_v6, %v983_v7  ;;  %v901_v14 = vpop.f32.mrb[4].mxu0 }
 0x27c   : > { %v986_v15 = vmul.f32 %v971_v56, %v951_v11  ;;  %v1008_v19 = vadd.f32 %v993_v6, %v984_v10  ;;  %v903_v20 = vpop.f32.mrb[5].mxu0 }
 0x27d   : > { %v2101_v26 = vmax.f32 %v1007_v13, 0.0  ;;  %v1009_v28 = vadd.f32 %v997_v62, %v985_v12  ;;  %v905_v30 = vpop.f32.mrb[6].mxu0 }
 0x27e   : > { %v2103_v31 = vmax.f32 %v1008_v19, 0.0  ;;  %v1010_v17 = vadd.f32 %v997_v62, %v986_v15  ;;  %v907_v18 = vpop.f32.mrb[7].mxu0  ;;  %v954_v23 = vpop.f32.mrb[4].mxu1  ;;  %v2136_v62 = vld [vmem:[%s2228_s5] sm:$0x1] }
 0x27f   : > { %v2105_v32 = vmax.f32 %v1009_v28, 0.0  ;;  %v955_v22 = vadd.f32 %v954_v23, %v901_v14  ;;  %v956_v33 = vpop.f32.mrb[5].mxu1  ;;  %v1166_v63 = vrot.slane %v2136_v62, %v1879_v16 }
 0x280   : > { %v2107_v34 = vmax.f32 %v1010_v17, 0.0  ;;  %v957_v35 = vadd.f32 %v956_v33, %v903_v20  ;;  %v958_v36 = vpop.f32.mrb[6].mxu1  ;;  %v1128_v37 = vadd.f32 %v2103_v31, %v2101_v26 }
 0x281   : > { %v987_v38 = vmul.f32 %v976_v57, %v955_v22  ;;  %v959_v39 = vadd.f32 %v958_v36, %v905_v30  ;;  %v960_v40 = vpop.f32.mrb[7].mxu1  ;;  %v1023_v47 = vpack.c.bf16 %v2105_v32, %v2101_v26 }
 0x282   : > { %v988_v41 = vmul.f32 %v976_v57, %v957_v35  ;;  %v961_v43 = vadd.f32 %v960_v40, %v907_v18  ;;  %1129 = vadd.xlane.f32.xlu0 %v1128_v37  ;;  %v1131_v44 = vadd.f32 %v2107_v34, %v2105_v32  ;;  %v1024_v46 = vpack.c.bf16 %v2107_v34, %v2103_v31 }
 0x283   : > { %v1011_v48 = vadd.f32 %v1001_v42, %v987_v38  ;;  %v989_v49 = vmul.f32 %v981_v21, %v959_v39  ;;  %v1027_v38 = vld [vmem:[#allocation7] sm:$0xf] }
 0x284   : > { %v1012_v50 = vadd.f32 %v1001_v42, %v988_v41  ;;  %v990_v51 = vmul.f32 %v981_v21, %v961_v43  ;;  %1132 = vadd.xlane.f32.xlu1 %v1131_v44  ;;  %1031 = vmatprep.subr.bf16.mxu1 %v1024_v46 }
 0x285   : > { %v2117_v52 = vmax.f32 %v1011_v48, 0.0  ;;  %v1013_v53 = vadd.f32 %v1005_v45, %v989_v49  ;;  %1032 = vmatpush1.bf16.msra.mxu1 %v1023_v47 }
 0x286   : > { %v2119_v54 = vmax.f32 %v1012_v50, 0.0  ;;  %v1014_v55 = vadd.f32 %v1005_v45, %v990_v51 }
 0x287   : > { %v2121_v56 = vmax.f32 %v1013_v53, 0.0 }
 0x288   : > { %v2123_v57 = vmax.f32 %v1014_v55, 0.0  ;;  %v1134_v58 = vadd.f32 %v2119_v54, %v2117_v52  ;;  %v290_v55 = vld [vmem:[%s2227_s4] sm:$0xff] }
 0x289   : > { %v1025_v60 = vpack.c.bf16 %v2121_v56, %v2117_v52 }
 0x28a   : > { %1135 = vadd.xlane.f32.xlu0 %v1134_v58  ;;  %v1026_v59 = vpack.c.bf16 %v2123_v57, %v2119_v54  ;;  %v1137_v61 = vadd.f32 %v2123_v57, %v2121_v56  ;;  %v1681_v58 = vmov 2  }
 0x28c   : > { %1033 = vmatprep.subr.bf16.mxu1 %v1026_v59 }
 0x28d   : > { %1034 = vmatpush1.bf16.msra.mxu1 %v1025_v60 }
 0x28e   : > { %1138 = vadd.xlane.f32.xlu0 %v1137_v61 }
 0x290   : > { %1403 = vmatmul.mubr.msk.bf16.vlgmr.msra.gmra.mrb[8].mxu1 %vm850_vm12, %v1027_v38 }
 0x295   : > { %1167 = vrot.lane.b32.xlu1 %v1166_v63, %s1679_s16 }
 0x30f   : > { %v1130_v0 = vpop.xlane.xlu0 %1129 }
 0x310   : > { %v1141_v4 = vmul.f32 0.00390625, %v1130_v0 }
 0x311   : > { %v1133_v2 = vpop.xlane.xlu1 %1132 }
 0x312   : > { %v1142_v3 = vmul.f32 0.00390625, %v1133_v2  ;;  %v1145_v7 = vmul.f32 %v1141_v4, %v2022_v24 }
 0x314   : > { %v1146_v5 = vmul.f32 %v1142_v3, %v2029_v25  ;;  %v1150_v12 = vsel %vm1149_vm8, %v1145_v7, 0.0 }
 0x315   : > { %v1168_v33 = vpop.permute.xlu1 %1167 }
 0x316   : > { %v1151_v9 = vsel %vm1149_vm8, %v1146_v5, 0.0 }
 0x317   : > { %v1136_v6 = vpop.xlane.xlu0 %1135  ;;  %v1152_v15 = vadd.f32 %v1151_v9, %v1150_v12 }
 0x318   : > { %v1143_v8 = vmul.f32 0.00390625, %v1136_v6 }
 0x31a   : > { %v1147_v10 = vmul.f32 %v1143_v8, %v2035_v27 }
 0x31b   : > { %v1139_v11 = vpop.xlane.xlu0 %1138 }
 0x31c   : > { %v1153_v13 = vsel %vm1149_vm8, %v1147_v10, 0.0  ;;  %v1144_v14 = vmul.f32 0.00390625, %v1139_v11 }
 0x31d   : > { %v1154_v20 = vadd.f32 %v1153_v13, %v1152_v15 }
 0x31e   : > { %v1148_v19 = vmul.f32 %v1144_v14, %v2044_v29 }
 0x320   : > { %v1155_v21 = vsel %vm1149_vm8, %v1148_v19, 0.0 }
 0x321   : > { %v1156_v28 = vadd.f32 %v1155_v21, %v1154_v20 }
 0x323   : > { %v1157_v30 = vrot.slane %v1156_v28, 4 }
 0x325   : > { %v1158_v17 = vadd.f32 %v1157_v30, %v1156_v28 }
 0x327   : > { %v1159_v18 = vrot.slane %v1158_v17, 2 }
 0x329   : > { %v1160_v23 = vadd.f32 %v1159_v18, %v1158_v17 }
 0x32b   : > { %v1161_v22 = vrot.slane %v1160_v23, 1 }
 0x32d   : > { %v1162_v35 = vadd.f32 %v1161_v22, %v1160_v23 }
 0x32f   : > { %v1170_v36 = vadd.f32 %v1168_v33, %v1162_v35 }
 0x331   : > { %v1171_v37 = vmax.f32 %v1170_v36, 0.0 }
 0x333   : > { %v1175_v39 = vrot.slane %v1171_v37, %v1879_v16 }
 0x335   : > { %1177 = vrot.lane.b32.xlu0 %v1175_v39, %s1679_s16 }
 0x363   : > { %v1065_v59 = vpop.f32.mrb[8].mxu1 }
 0x364   : > { %v1067_v60 = vpop.f32.mrb[9].mxu1 }
 0x365   : > { %v1069_v61 = vpop.f32.mrb[10].mxu1 }
 0x366   : > { %v1070_v63 = vpop.f32.mrb[11].mxu1 }
 0x3a7   : > { %v1178_v40 = vpop.permute.xlu0 %1177 }
 0x3a8   : > { %v1182_v41 = vmul.f32 %v1178_v40, %v2035_v27  ;;  %v1180_v42 = vmul.f32 %v1178_v40, %v2022_v24  ;;  %v1181_v43 = vmul.f32 %v1178_v40, %v2029_v25  ;;  %v1183_v44 = vmul.f32 %v1178_v40, %v2044_v29 }
 0x3aa   : > { %1192 = vrot.lane.b32.xlu0 %v1182_v41, %s1680_s28  ;;  %1188 = vrot.lane.b32.xlu1 %v1180_v42, %s1680_s28 }
 0x3ae   : > { %1190 = vrot.lane.b32.xlu1 %v1181_v43, %s1680_s28 }
 0x3b2   : > { %1194 = vrot.lane.b32.xlu1 %v1183_v44, %s1680_s28 }
 0x41c   : > { %v1189_v45 = vpop.permute.xlu1 %1188  ;;  %v1193_v47 = vpop.permute.xlu0 %1192 }
 0x41d   : > { %v1201_v46 = vsel %vm1200_vm0, %v1189_v45, 0.0  ;;  %v1207_v49 = vsel %vm1200_vm0, %v1193_v47, 0.0 }
 0x41e   : > { %1202 = vadd.xlane.f32.xlu0 %v1201_v46 }
 0x420   : > { %v1191_v48 = vpop.permute.xlu1 %1190 }
 0x421   : > { %v1204_v50 = vsel %vm1200_vm0, %v1191_v48, 0.0 }
 0x422   : > { %1208 = vadd.xlane.f32.xlu0 %v1207_v49  ;;  %1205 = vadd.xlane.f32.xlu1 %v1204_v50 }
 0x424   : > { %v1195_v51 = vpop.permute.xlu1 %1194 }
 0x425   : > { %v1210_v53 = vsel %vm1200_vm0, %v1195_v51, 0.0 }
 0x426   : > { %1211 = vadd.xlane.f32.xlu0 %v1210_v53 }
 0x433   : > { %1074 = vperm.xlu1 %1498, %v290_v55  }
 0x437   : > { %1499 = vset.pattern.permute.xlu1 %v1681_v58 }
 0x438   : > { %1088 = vperm.xlu1 %1499, %v290_v55  }
 0x43c   : > { %1080 = vperm.xlu0 %1494, %v290_v55   ;;  %1500 = vset.pattern.permute.xlu1 %v1669_v1 }
 0x43d   : > { %1107 = vperm.xlu1 %1500, %v2136_v62  }
 0x440   : > { %1501 = vset.pattern.permute.xlu0 %v1681_v58 }
 0x441   : > { %1502 = vset.pattern.permute.xlu1 %v1681_v58 }
 0x4ab   : > { %v1203_v0 = vpop.xlane.xlu0 %1202 }
 0x4ac   : > { %v1213_v2 = vadd.f32 %v1203_v0, %v2022_v24 }
 0x4ae   : > { %v1217_v3 = vsub.f32 0.0, %v1213_v2 }
 0x4af   : > { %v1209_v4 = vpop.xlane.xlu0 %1208  ;;  %v1206_v5 = vpop.xlane.xlu1 %1205 }
 0x4b0   : > { %v1221_v6 = vmul.f32 1.442695, %v1217_v3  ;;  %v1215_v7 = vadd.f32 %v1209_v4, %v2035_v27  ;;  %v1214_v8 = vadd.f32 %v1206_v5, %v2029_v25 }
 0x4b2   : > { %1511 = vpow2.f32 %v1221_v6  ;;  %v1219_v9 = vsub.f32 0.0, %v1215_v7  ;;  %v1218_v10 = vsub.f32 0.0, %v1214_v8 }
 0x4b3   : > { %v1212_v1 = vpop.xlane.xlu0 %1211  ;;  %v1075_v23 = vpop.permute.xlu1 %1074 }
 0x4b4   : > { %v1225_v11 = vmul.f32 1.442695, %v1219_v9  ;;  %v1223_v12 = vmul.f32 1.442695, %v1218_v10  ;;  %v1216_v62 = vadd.f32 %v1212_v1, %v2044_v29  ;;  %v1077_v22 = vmul.f32 %v1075_v23, %v1065_v59 }
 0x4b5   : > { %v1078_v33 = vmul.f32 %v1075_v23, %v1067_v60 }
 0x4b6   : > { %1513 = vpow2.f32 %v1225_v11  ;;  %v1220_v13 = vsub.f32 0.0, %v1216_v62 }
 0x4b7   : > { %1515 = vpow2.f32 %v1223_v12  ;;  %v1089_v40 = vpop.permute.xlu1 %1088 }
 0x4b8   : > { %v1227_v24 = vmul.f32 1.442695, %v1220_v13 }
 0x4ba   : > { %1517 = vpow2.f32 %v1227_v24 }
 0x4bb   : > { %v1081_v35 = vpop.permute.xlu0 %1080 }
 0x4bc   : > { %v1512_v14 = vpop.eup %1511  ;;  %v1083_v36 = vadd.f32 %v1081_v35, %v1077_v22  ;;  %v1084_v37 = vadd.f32 %v1081_v35, %v1078_v33  ;;  %v1108_v55 = vpop.permute.xlu1 %1107 }
 0x4bd   : > { %v1229_v15 = vadd.f32 1.0, %v1512_v14  ;;  %v1113_v59 = vrot.slane %v1108_v55, %v1879_v16 }
 0x4be   : > { %v1085_v38 = vmax.f32 %v1083_v36, 0.0  ;;  %v1086_v39 = vmax.f32 %v1084_v37, 0.0 }
 0x4bf   : > { %1519 = vrcp.f32 %v1229_v15 }
 0x4c0   : > { %v1514_v19 = vpop.eup %1513  ;;  %v1091_v41 = vmul.f32 %v1089_v40, %v1085_v38  ;;  %v1092_v42 = vmul.f32 %v1089_v40, %v1086_v39 }
 0x4c1   : > { %v1516_v27 = vpop.eup %1515  ;;  %v1231_v21 = vadd.f32 1.0, %v1514_v19 }
 0x4c2   : > { %v1230_v20 = vadd.f32 1.0, %v1516_v27  ;;  %v1093_v43 = vrot.slane %v1091_v41, 4  ;;  %v1099_v44 = vrot.slane %v1092_v42, 4 }
 0x4c4   : > { %v1518_v25 = vpop.eup %1517  ;;  %1521 = vrcp.f32 %v1230_v20  ;;  %v1094_v45 = vadd.f32 %v1093_v43, %v1091_v41  ;;  %v1100_v46 = vadd.f32 %v1099_v44, %v1092_v42 }
 0x4c5   : > { %v1232_v28 = vadd.f32 1.0, %v1518_v25 }
 0x4c6   : > { %v1095_v47 = vrot.slane %v1094_v45, 2  ;;  %v1101_v48 = vrot.slane %v1100_v46, 2 }
 0x4c7   : > { %1523 = vrcp.f32 %v1232_v28 }
 0x4c8   : > { %1525 = vrcp.f32 %v1231_v21  ;;  %v1096_v49 = vadd.f32 %v1095_v47, %v1094_v45  ;;  %v1102_v50 = vadd.f32 %v1101_v48, %v1100_v46 }
 0x4c9   : > { %v1520_v30 = vpop.eup %1519 }
 0x4ca   : > { %1245 = vperm.xlu0 %1501, %v1520_v30   ;;  %v1097_v51 = vrot.slane %v1096_v49, 1  ;;  %v1103_v53 = vrot.slane %v1102_v50, 1 }
 0x4cc   : > { %v1098_v58 = vadd.f32 %v1097_v51, %v1096_v49  ;;  %v1104_v60 = vadd.f32 %v1103_v53, %v1102_v50 }
 0x4ce   : > { %v1522_v29 = vpop.eup %1521  ;;  %v1114_v61 = vadd.f32 %v1113_v59, %v1098_v58  ;;  %v1115_v63 = vadd.f32 %v1113_v59, %v1104_v60 }
 0x4cf   : > { %1250 = vperm.xlu1 %1502, %v1522_v29  }
 0x4d0   : > { %v1116_v0 = vsub.f32 0.0, %v1114_v61  ;;  %v1117_v2 = vsub.f32 0.0, %v1115_v63 }
 0x4d1   : > { %v1524_v17 = vpop.eup %1523 }
 0x4d2   : > { %v1526_v18 = vpop.eup %1525  ;;  %1260 = vperm.xlu0 %1501, %v1524_v17   ;;  %v1118_v3 = vmul.f32 1.442695, %v1116_v0  ;;  %v1120_v4 = vmul.f32 1.442695, %v1117_v2 }
 0x4d3   : > { %1255 = vperm.xlu1 %1502, %v1526_v18  }
 0x4d4   : > { %1527 = vpow2.f32 %v1118_v3 }
 0x4d5   : > { %1529 = vpow2.f32 %v1120_v4 }
 0x4de   : > { %v1528_v5 = vpop.eup %1527 }
 0x4df   : > { %v1530_v6 = vpop.eup %1529  ;;  %v1122_v7 = vadd.f32 1.0, %v1528_v5 }
 0x4e0   : > { %v1123_v8 = vadd.f32 1.0, %v1530_v6 }
 0x4e1   : > { %1531 = vrcp.f32 %v1122_v7 }
 0x4e2   : > { %1533 = vrcp.f32 %v1123_v8 }
 0x4eb   : > { %v1532_v9 = vpop.eup %1531 }
 0x4ec   : > { %v1534_v10 = vpop.eup %1533  ;;  %v1241_v16 = vadd.f32 1.0, %v1532_v9 }
 0x4ed   : > { %v1242_v11 = vadd.f32 1.0, %v1534_v10 }
 0x549   : > { %v1246_v1 = vpop.permute.xlu0 %1245 }
 0x54a   : > { %v1263_v12 = vmul.f32 %v1246_v1, %v2101_v26  ;;  %v1264_v62 = vmul.f32 %v1246_v1, %v2103_v31 }
 0x54c   : > { %v1271_v13 = vmul.f32 %v1263_v12, %v1241_v16  ;;  %v1272_v24 = vmul.f32 %v1264_v62, %v1242_v11 }
 0x54e   : > { %1279 = vst [vmem:[%s282_s29] sm:$0xff] %v1271_v13  ;;  %1280 = vst [vmem:[%s282_s29 + $0x8] sm:$0xff] %v1272_v24  ;;  %v1251_v14 = vpop.permute.xlu1 %1250 }
 0x54f   : > { %v1265_v15 = vmul.f32 %v1251_v14, %v2105_v32  ;;  %v1266_v19 = vmul.f32 %v1251_v14, %v2107_v34 }
 0x551   : > { %v1273_v27 = vmul.f32 %v1265_v15, %v1241_v16  ;;  %v1274_v20 = vmul.f32 %v1266_v19, %v1242_v11  ;;  %v1261_v25 = vpop.permute.xlu0 %1260 }
 0x552   : > { %v1269_v21 = vmul.f32 %v1261_v25, %v2121_v56  ;;  %v1270_v26 = vmul.f32 %v1261_v25, %v2123_v57  ;;  %v1256_v31 = vpop.permute.xlu1 %1255 }
 0x553   : > { %1281 = vst [vmem:[%s282_s29 + $0x10] sm:$0xff] %v1273_v27  ;;  %1282 = vst [vmem:[%s282_s29 + $0x18] sm:$0xff] %v1274_v20  ;;  %v1267_v28 = vmul.f32 %v1256_v31, %v2117_v52  ;;  %v1268_v32 = vmul.f32 %v1256_v31, %v2119_v54 }
 0x554   : > { %v1277_v30 = vmul.f32 %v1269_v21, %v1241_v16  ;;  %v1278_v34 = vmul.f32 %v1270_v26, %v1242_v11 }
 0x555   : > { %v1275_v56 = vmul.f32 %v1267_v28, %v1241_v16  ;;  %v1276_v29 = vmul.f32 %v1268_v32, %v1242_v11 }
 0x556   : > { %1285 = vst [vmem:[%s282_s29 + $0x30] sm:$0xff] %v1277_v30  ;;  %1286 = vst [vmem:[%s282_s29 + $0x38] sm:$0xff] %v1278_v34 }
 0x557   : > { %1283 = vst [vmem:[%s282_s29 + $0x20] sm:$0xff] %v1275_v56  ;;  %1284 = vst [vmem:[%s282_s29 + $0x28] sm:$0xff] %v1276_v29 }
 0x558   : > { %1606 = shalt.err (!%p1603_p13)
}
 0x559   : > { %s1607_s16 = scalar_lea.hbm %s2176_s25, 1024  ;;  %s1611_s26 = scalar_lea.hbm %s2229_s6, 2048 }
 0x55a   : > { %p1608_p7 = scmp.ne.s32.totalorder %s2176_s25, %s1607_s16  ;;  %p1612_p1 = scmp.lt.u32.totalorder %s2176_s25, %s2229_s6 }
 0x55b   : > { %p1613_p11 = scmp.lt.u32.totalorder %s1611_s26, %s1607_s16  ;;  %p1615_p9 = scmp.lt.u32.totalorder %s1607_s16, %s2176_s25 }
 0x55c   : > { %p1609_p3 = pnand %p1608_p7, %p2249_p10 }
 0x55d   : > { %p1614_p8 = por %p1613_p11, %p1612_p1 }
 0x55e   : > { %p1610_p12 = pneg %p1609_p3 }
 0x55f   : > { %p1616_p2 = por %p1615_p9, %p1614_p8 }
 0x561   : > { %p1617_p4 = pnand %p1616_p2, %p1610_p12 }
 0x563   : > { %1620 = shalt.err (!%p1617_p4)
}
 0x564   : > { %s1683_s18 = smov 256  }
 0x565   : > { %1425 = dma.vmem_to_hbm [thread:$0]  (%p2249_p10), %s2178_s7, 1024, %s2176_s25, %s1288_s19, %s1683_s18, %s1683_s18, %s1676_s15  }
 0x566 PF: > { %s1316_s13 = sand.u32 1, %s1651_s21   ;;  %p2250_p5 = scmp.ne.s32.totalorder %s2239_s10, 0 }
 0x567   : > { %p2251_p0 = scmp.ge.s32.totalorder %s1663_s24, 2  ;;  %s1317_s20 = scalar_lea.sflag [#allocation6], %s1316_s13 }
 0x569   : > { %p1436_p6 = pnand %p2251_p0, %p2250_p5 }
 0x56b   : > { %1646 = dma.done.wait (!%p1436_p6), %s1317_s20, 1024  }
 0x56c   : > { %1648 = vsyncadd (!%p1436_p6), %s1317_s20, 4294966272  ;;  %s2252_s9 = sld [smem:[#allocation13_spill]]  ;;  %p20_p13 = scmp.ge.s32.totalorder %s1744_s27, 4  }
 0x56d   : > { %s2253_s21 = smov %s1655_s22  ;;  %s2254_s22 = smov %s1659_s23 }
 0x56e   : > { %s2256_s24 = smov %s1744_s27  ;;  %22 = sbr.rel (!%p20_p13) target bundleno = 6 (0x6), region = 93 }
 0x572   : > { %s2255_s23 = smov %s2252_s9 }
 0x575   :  { %1322 = vsyncpa [#allocation5], 1 }
 0x576   :  { %1324 = vsyncpa [#allocation5 + $0x1], 1 }
 0x577   :  { %1325 = vsyncpa [#allocation8], 1 }
 0x578   :  { %1326 = vsyncpa [#allocation6], 1 }
 0x579   :  { %1328 = vsyncpa [#allocation6 + $0x1], 1 }

</bundles_post_ra>
